<compile_context>
chip_gen: v7x
topology: tpu7x:2x2x1
jax: 0.10.0
libtpu: 0.0.40
codegen_flags: <defaults>
</compile_context>

<pallas_src>
import functools

import jax
import jax.numpy as jnp
from jax.experimental import pallas as pl
from jax.experimental.pallas import tpu as pltpu

LANE = 128


def _round_up(x, m):
    return (x + m - 1) // m * m


def _bf16_round(a):
    return a.astype(jnp.bfloat16).astype(jnp.float32)


def _kw_pack(a, W):
    """a: (P, W+2, C) -> (P*W, 3*C): the 3 kw taps packed along K (kw-major)."""
    P, _, C = a.shape
    return jnp.concatenate(
        [a[:, 0:W], a[:, 1:W + 1], a[:, 2:W + 2]], axis=-1
    ).reshape(P * W, 3 * C)


def _make_kernel(TH, W, ns, has_proj, pack_kh_in_n):
    def kernel(xs_ref, w1_ref, s1_ref, b1_ref, w2_ref, s2_ref, b2_ref, *rest):
        """One (batch, row-strip) tile per grid step.

        xs_ref : (1, TH+4, W+2, Cp) bf16 input strip (2-row halo each side,
                                    1-col halo, lane-padded channels)
        w1_ref : pack_kh_in_n -> (3*Cp, 3*Cm)  else (3, 3*Cp, Cm)   bf16
        w2_ref : pack_kh_in_n -> (3*Cm, 3*Cm)  else (3, 3*Cm, Cm)   bf16
        s*/b*  : (1, Cm) folded BatchNorm scale / bias, f32
        wsc/ssc/bsc (proj only): (Cp, Cm) bf16, (1, Cm), (1, Cm)
        out_ref: (1, TH, W, Cm) bf16
        """
        if has_proj:
            wsc_ref, ssc_ref, bsc_ref, out_ref = rest
        else:
            (out_ref,) = rest

        s = pl.program_id(1)
        Cp = xs_ref.shape[-1]
        Cm = out_ref.shape[-1]

        xw = xs_ref[0]                                    # (TH+4, W+2, Cp) bf16

        # ---- conv1 (3x3, pad=1, stride=1) on TH+2 rows (strip + conv2 halo) ----
        if pack_kh_in_n:
            patch1 = _kw_pack(xw, W)                      # ((TH+4)*W, 3*Cp)
            y1 = jnp.dot(patch1, w1_ref[...],
                         preferred_element_type=jnp.float32)
            y1 = y1.reshape(TH + 4, W, 3 * Cm)
            acc1 = (y1[0:TH + 2, :, 0:Cm]
                    + y1[1:TH + 3, :, Cm:2 * Cm]
                    + y1[2:TH + 4, :, 2 * Cm:3 * Cm])     # (TH+2, W, Cm) f32
        else:
            acc1 = None
            for kh in range(3):
                patch = _kw_pack(xw[kh:kh + TH + 2], W)   # ((TH+2)*W, 3*Cp)
                t = jnp.dot(patch, w1_ref[kh],
                            preferred_element_type=jnp.float32)
                acc1 = t if acc1 is None else acc1 + t
            acc1 = acc1.reshape(TH + 2, W, Cm)

        # bn1 + relu in f32, then drop to bf16 for conv2's MXU operand.
        mid = jnp.maximum(acc1 * s1_ref[...] + b1_ref[...], 0.0)
        mid = mid.astype(jnp.bfloat16)                    # (TH+2, W, Cm)

        # Zero the conv2 halo rows that fall outside the image (ghost rows of
        # the boundary strips); interior strips keep both real halo rows.
        top = jnp.where(s > 0, mid[0:1], 0.0)
        bot = jnp.where(s < ns - 1, mid[TH + 1:TH + 2], 0.0)
        mid = jnp.concatenate([top, mid[1:TH + 1], bot], axis=0)

        # Re-pad W by one zero column each side as a value (no scratch ref, no
        # masked halo stores).
        zc = jnp.zeros((TH + 2, 1, Cm), jnp.bfloat16)
        mid_p = jnp.concatenate([zc, mid, zc], axis=1)    # (TH+2, W+2, Cm)

        # ---- conv2 (3x3, pad=1, stride=1) on the TH output rows ----
        if pack_kh_in_n:
            patch2 = _kw_pack(mid_p, W)                   # ((TH+2)*W, 3*Cm)
            y2 = jnp.dot(patch2, w2_ref[...],
                         preferred_element_type=jnp.float32)
            y2 = y2.reshape(TH + 2, W, 3 * Cm)
            acc2 = (y2[0:TH, :, 0:Cm]
                    + y2[1:TH + 1, :, Cm:2 * Cm]
                    + y2[2:TH + 2, :, 2 * Cm:3 * Cm])     # (TH, W, Cm) f32
        else:
            acc2 = None
            for kh in range(3):
                patch = _kw_pack(mid_p[kh:kh + TH], W)    # (TH*W, 3*Cm)
                t = jnp.dot(patch, w2_ref[kh],
                            preferred_element_type=jnp.float32)
                acc2 = t if acc2 is None else acc2 + t
            acc2 = acc2.reshape(TH, W, Cm)

        out2 = acc2 * s2_ref[...] + b2_ref[...]           # bn2 (f32)

        # ---- shortcut ----
        x_center = xw[2:TH + 2, 1:W + 1, :]               # (TH, W, Cp) bf16
        if has_proj:
            sc = jnp.dot(x_center.reshape(TH * W, Cp), wsc_ref[...],
                         preferred_element_type=jnp.float32)
            sc = (sc * ssc_ref[...] + bsc_ref[...]).reshape(TH, W, Cm)
        else:
            sc = x_center.astype(jnp.float32)             # identity (Cp == Cm)

        out = jnp.maximum(out2 + sc, 0.0)
        out_ref[...] = out.reshape(1, TH, W, Cm).astype(out_ref.dtype)

    return kernel


def _default_pack_kh_in_n():
    # v6e/v7x MXUs are 256 wide -> pack kh along N; v5e is 128 wide -> keep N=C.
    try:
        kind = jax.devices()[0].device_kind.lower()
        if "v5 lite" in kind or "v5e" in kind or "v5litepod" in kind:
            return False
    except Exception:
        pass
    return True


def basic_block_forward(x_nchw, params, *, row_tile=8, pack_kh_in_n=None):
    """BasicBlock forward (eval-mode BN folded to scale/bias). Output bf16 NCHW."""
    if pack_kh_in_n is None:
        pack_kh_in_n = _default_pack_kh_in_n()

    x = jnp.transpose(x_nchw, (0, 2, 3, 1))               # NCHW -> NHWC
    N, H, W, Cin = x.shape
    w1 = params["w1"]                                      # (3, 3, Cin, Cmid) HWIO
    Cmid = w1.shape[-1]
    Cin_p = _round_up(Cin, LANE)
    Cmid_p = _round_up(Cmid, LANE)

    TH = row_tile if (row_tile and H % row_tile == 0) else H
    ns = H // TH

    # One fused pad: 2-row H halo (conv halo + strip halos), 1-col W halo,
    # lane-dense channel pad, bf16 cast.
    xp = jnp.pad(x, ((0, 0), (2, 2), (1, 1), (0, Cin_p - Cin))).astype(jnp.bfloat16)
    # Pre-materialize overlapping row strips so every BlockSpec stays a plain
    # non-overlapping block (halo duplication = 4/TH of input bytes).
    strips = jnp.stack(
        [xp[:, s * TH: s * TH + TH + 4] for s in range(ns)], axis=1
    ).reshape(N * ns, TH + 4, W + 2, Cin_p)

    def pad_w(w, ci, cip, cop):
        co = w.shape[-1]
        return jnp.pad(w, ((0, 0), (0, 0), (0, cip - ci), (0, cop - co)))

    if pack_kh_in_n:
        def pack_w(w, ci, cip, cop):                       # rows (kw,ci)=K, cols (kh,co)=N
            wp = pad_w(w, ci, cip, cop)
            return wp.transpose(1, 2, 0, 3).reshape(3 * cip, 3 * cop).astype(jnp.bfloat16)
    else:
        def pack_w(w, ci, cip, cop):                       # (kh, kw*ci=K, co=N)
            wp = pad_w(w, ci, cip, cop)
            return wp.reshape(3, 3 * cip, cop).astype(jnp.bfloat16)

    w1r = pack_w(w1, Cin, Cin_p, Cmid_p)
    w2r = pack_w(params["w2"], Cmid, Cmid_p, Cmid_p)

    def pad_vec(v):
        return jnp.pad(v, (0, Cmid_p - Cmid)).reshape(1, Cmid_p).astype(jnp.float32)

    s1, b1 = pad_vec(params["s1"]), pad_vec(params["b1"])
    s2, b2 = pad_vec(params["s2"]), pad_vec(params["b2"])

    has_proj = "wsc" in params
    inputs = [strips, w1r, s1, b1, w2r, s2, b2]

    def full(a):
        nd = a.ndim
        return pl.BlockSpec(a.shape, lambda n, s, _nd=nd: (0,) * _nd)

    in_specs = [pl.BlockSpec((1, TH + 4, W + 2, Cin_p),
                             lambda n, s: (n * ns + s, 0, 0, 0))]
    in_specs += [full(a) for a in inputs[1:]]

    if has_proj:
        wsc = jnp.pad(params["wsc"],
                      ((0, Cin_p - Cin), (0, Cmid_p - Cmid))).astype(jnp.bfloat16)
        ssc, bsc = pad_vec(params["ssc"]), pad_vec(params["bsc"])
        inputs += [wsc, ssc, bsc]
        in_specs += [full(wsc), full(ssc), full(bsc)]

    kernel = _make_kernel(TH, W, ns, has_proj, pack_kh_in_n)

    out_nhwc = pl.pallas_call(
        kernel,
        out_shape=jax.ShapeDtypeStruct((N, H, W, Cmid_p), jnp.bfloat16),
        grid_spec=pltpu.PrefetchScalarGridSpec(
            num_scalar_prefetch=0,
            grid=(N, ns),
            in_specs=in_specs,
            out_specs=pl.BlockSpec((1, TH, W, Cmid_p), lambda n, s: (n, s, 0, 0)),
        ),
        compiler_params=pltpu.CompilerParams(
            dimension_semantics=("parallel", "parallel"),
            # A cap, not a reservation; <= physical VMEM on v5e/v6e/v7x.
            vmem_limit_bytes=64 * 1024 * 1024,
        ),
    )(*inputs)

    out = out_nhwc[..., :Cmid]                             # drop lane padding
    return jnp.transpose(out, (0, 3, 1, 2))                # NHWC -> NCHW (bf16)


# ----------------------------- parameter setup -----------------------------
def make_params(key, in_planes, planes, eps=1e-5):
    ks = jax.random.split(key, 6)

    def fold_bn(gamma, beta, mean, var):
        scale = gamma / jnp.sqrt(var + eps)
        return scale, beta - mean * scale

    def bn_params(k):
        k1, k2, k3, k4 = jax.random.split(k, 4)
        gamma = 1.0 + 0.1 * jax.random.normal(k1, (planes,), jnp.float32)
        beta = 0.1 * jax.random.normal(k2, (planes,), jnp.float32)
        mean = 0.1 * jax.random.normal(k3, (planes,), jnp.float32)
        var = jnp.abs(jax.random.normal(k4, (planes,), jnp.float32)) + 0.5
        return fold_bn(gamma, beta, mean, var)

    w1 = 0.1 * jax.random.normal(ks[0], (3, 3, in_planes, planes), jnp.float32)  # HWIO
    w2 = 0.1 * jax.random.normal(ks[1], (3, 3, planes, planes), jnp.float32)
    s1, b1 = bn_params(ks[2])
    s2, b2 = bn_params(ks[3])

    p = dict(w1=w1, w2=w2, s1=s1, b1=b1, s2=s2, b2=b2)
    if in_planes != planes:   # projection shortcut: 1x1 conv + BN (stride fixed to 1)
        p["wsc"] = 0.1 * jax.random.normal(ks[4], (in_planes, planes), jnp.float32)
        p["ssc"], p["bsc"] = bn_params(ks[5])
    # identity shortcut: no extra params (fully specialized in the kernel)
    return p


# ------------------------------ pure-JAX reference -------------------------
def ref_forward(x_nchw, p):
    x = jnp.transpose(x_nchw, (0, 2, 3, 1)).astype(jnp.float32)

    def conv3(x, w):
        return jax.lax.conv_general_dilated(
            x, w, (1, 1), "SAME", dimension_numbers=("NHWC", "HWIO", "NHWC"))

    out = jax.nn.relu(conv3(x, p["w1"]) * p["s1"] + p["b1"])
    out = conv3(out, p["w2"]) * p["s2"] + p["b2"]
    if "wsc" in p:
        sc = jnp.einsum("nhwc,cd->nhwd", x, p["wsc"]) * p["ssc"] + p["bsc"]
    else:
        sc = x
    out = jax.nn.relu(out + sc)
    return jnp.transpose(out, (0, 3, 1, 2))


if __name__ == "__main__":
    key = jax.random.PRNGKey(0)
    N, H, W = 2, 16, 16
    configs = [(4, 8), (8, 8)]   # (projection shortcut, identity shortcut)

    for idx, (in_planes, planes) in enumerate(configs):
        k_x, k_p = jax.random.split(jax.random.fold_in(key, idx))
        x = jax.random.normal(k_x, (N, in_planes, H, W), jnp.float32)  # NCHW
        params = make_params(k_p, in_planes, planes)

        # Round MXU operands to bf16-representable values so the kernel (bf16
        # operands, f32 accumulation) and the f32 reference see identical
        # inputs; remaining diff = bf16 rounding of the conv2 input and of the
        # bf16 block output (intentional precision tradeoff).
        x = _bf16_round(x)
        for name in ("w1", "w2", "wsc"):
            if name in params:
                params[name] = _bf16_round(params[name])

        ref = jax.block_until_ready(ref_forward(x, params))

        # Exercise both matmul schemes (v6e/v7x kh-along-N and v5e 3-matmul)
        # with row_tile=4 so interior AND boundary strips are covered.
        for pack in (True, False):
            fwd = jax.jit(functools.partial(basic_block_forward,
                                            row_tile=4, pack_kh_in_n=pack))
            out = jax.block_until_ready(fwd(x, params))
            assert out.shape == (N, planes, H, W), out.shape
            assert out.dtype == jnp.bfloat16, out.dtype
            err = float(jnp.max(jnp.abs(out.astype(jnp.float32) - ref)))
            assert err < 4e-2, (in_planes, planes, pack, err)

    print("KERNEL_OK")
</pallas_src>

<mosaic_0001>
module attributes {stable_mosaic.version = 11 : i64} {
  func.func @kernel(%arg0: i32, %arg1: i32, %arg2: memref<1x8x18x128xbf16, #tpu.memory_space<vmem>>, %arg3: memref<384x384xbf16, #tpu.memory_space<vmem>>, %arg4: memref<1x128xf32, #tpu.memory_space<vmem>>, %arg5: memref<1x128xf32, #tpu.memory_space<vmem>>, %arg6: memref<384x384xbf16, #tpu.memory_space<vmem>>, %arg7: memref<1x128xf32, #tpu.memory_space<vmem>>, %arg8: memref<1x128xf32, #tpu.memory_space<vmem>>, %arg9: memref<128x128xbf16, #tpu.memory_space<vmem>>, %arg10: memref<1x128xf32, #tpu.memory_space<vmem>>, %arg11: memref<1x128xf32, #tpu.memory_space<vmem>>, %arg12: memref<1x4x16x128xbf16, #tpu.memory_space<vmem>>) attributes {dimension_semantics = [#tpu.dimension_semantics<parallel>, #tpu.dimension_semantics<parallel>], iteration_bounds = array<i64: 2, 4>, scalar_prefetch = 0 : i64, scratch_operands = 0 : i64, tpu.core_type = #tpu.core_type<tc>, window_params = [{transform_indices = @transform_0, window_bounds = array<i64: 1, 8, 18, 128>}, {pipeline_mode = #tpu.pipeline_mode<synchronous>, transform_indices = @transform_1, window_bounds = array<i64: 384, 384>}, {pipeline_mode = #tpu.pipeline_mode<synchronous>, transform_indices = @transform_2, window_bounds = array<i64: 1, 128>}, {pipeline_mode = #tpu.pipeline_mode<synchronous>, transform_indices = @transform_3, window_bounds = array<i64: 1, 128>}, {pipeline_mode = #tpu.pipeline_mode<synchronous>, transform_indices = @transform_4, window_bounds = array<i64: 384, 384>}, {pipeline_mode = #tpu.pipeline_mode<synchronous>, transform_indices = @transform_5, window_bounds = array<i64: 1, 128>}, {pipeline_mode = #tpu.pipeline_mode<synchronous>, transform_indices = @transform_6, window_bounds = array<i64: 1, 128>}, {pipeline_mode = #tpu.pipeline_mode<synchronous>, transform_indices = @transform_7, window_bounds = array<i64: 128, 128>}, {pipeline_mode = #tpu.pipeline_mode<synchronous>, transform_indices = @transform_8, window_bounds = array<i64: 1, 128>}, {pipeline_mode = #tpu.pipeline_mode<synchronous>, transform_indices = @transform_9, window_bounds = array<i64: 1, 128>}, {transform_indices = @transform_10, window_bounds = array<i64: 1, 4, 16, 128>}]} {
    %c0 = arith.constant 0 : index
    %c0_0 = arith.constant 0 : index
    %c0_1 = arith.constant 0 : index
    %c0_2 = arith.constant 0 : index
    %0 = vector.load %arg2[%c0, %c0_0, %c0_1, %c0_2] : memref<1x8x18x128xbf16, #tpu.memory_space<vmem>>, vector<1x8x18x128xbf16>
    %1 = vector.shape_cast %0 : vector<1x8x18x128xbf16> to vector<8x18x128xbf16>
    %2 = vector.extract_strided_slice %1 {offsets = [0, 0, 0], sizes = [8, 16, 128], strides = [1, 1, 1]} : vector<8x18x128xbf16> to vector<8x16x128xbf16>
    %3 = vector.extract_strided_slice %1 {offsets = [0, 1, 0], sizes = [8, 16, 128], strides = [1, 1, 1]} : vector<8x18x128xbf16> to vector<8x16x128xbf16>
    %4 = vector.extract_strided_slice %1 {offsets = [0, 2, 0], sizes = [8, 16, 128], strides = [1, 1, 1]} : vector<8x18x128xbf16> to vector<8x16x128xbf16>
    %5 = tpu.concatenate %2, %3, %4 in 2 : vector<8x16x128xbf16>, vector<8x16x128xbf16>, vector<8x16x128xbf16> -> vector<8x16x384xbf16>
    %6 = vector.shape_cast %5 : vector<8x16x384xbf16> to vector<128x384xbf16>
    %c0_3 = arith.constant 0 : index
    %c0_4 = arith.constant 0 : index
    %7 = vector.load %arg3[%c0_3, %c0_4] : memref<384x384xbf16, #tpu.memory_space<vmem>>, vector<384x384xbf16>
    %cst = arith.constant dense<0.000000e+00> : vector<128x384xf32>
    %8 = tpu.matmul %6, %7, %cst {dimension_numbers = #tpu.dot_dimension_numbers<[1], [0], [0], [1], [0, 0, 1, 1], [], []>} : vector<128x384xbf16>, vector<384x384xbf16>, vector<128x384xf32> -> vector<128x384xf32>
    %9 = vector.shape_cast %8 : vector<128x384xf32> to vector<8x16x384xf32>
    %10 = vector.extract_strided_slice %9 {offsets = [0, 0, 0], sizes = [6, 16, 128], strides = [1, 1, 1]} : vector<8x16x384xf32> to vector<6x16x128xf32>
    %11 = vector.extract_strided_slice %9 {offsets = [1, 0, 128], sizes = [6, 16, 128], strides = [1, 1, 1]} : vector<8x16x384xf32> to vector<6x16x128xf32>
    %12 = arith.addf %10, %11 : vector<6x16x128xf32>
    %13 = vector.extract_strided_slice %9 {offsets = [2, 0, 256], sizes = [6, 16, 128], strides = [1, 1, 1]} : vector<8x16x384xf32> to vector<6x16x128xf32>
    %14 = arith.addf %12, %13 : vector<6x16x128xf32>
    %c0_5 = arith.constant 0 : index
    %c0_6 = arith.constant 0 : index
    %15 = vector.load %arg4[%c0_5, %c0_6] : memref<1x128xf32, #tpu.memory_space<vmem>>, vector<1x128xf32>
    %16 = vector.shape_cast %15 : vector<1x128xf32> to vector<1x1x128xf32>
    %17 = vector.broadcast %16 : vector<1x1x128xf32> to vector<6x16x128xf32>
    %18 = arith.mulf %14, %17 : vector<6x16x128xf32>
    %c0_7 = arith.constant 0 : index
    %c0_8 = arith.constant 0 : index
    %19 = vector.load %arg5[%c0_7, %c0_8] : memref<1x128xf32, #tpu.memory_space<vmem>>, vector<1x128xf32>
    %20 = vector.shape_cast %19 : vector<1x128xf32> to vector<1x1x128xf32>
    %21 = vector.broadcast %20 : vector<1x1x128xf32> to vector<6x16x128xf32>
    %22 = arith.addf %18, %21 : vector<6x16x128xf32>
    %cst_9 = arith.constant 0.000000e+00 : f32
    %23 = vector.broadcast %cst_9 : f32 to vector<6x16x128xf32>
    %24 = arith.maximumf %22, %23 : vector<6x16x128xf32>
    %25 = arith.truncf %24 : vector<6x16x128xf32> to vector<6x16x128xbf16>
    %c0_i32 = arith.constant 0 : i32
    %26 = arith.cmpi sgt, %arg1, %c0_i32 : i32
    %27 = vector.extract_strided_slice %25 {offsets = [0, 0, 0], sizes = [1, 16, 128], strides = [1, 1, 1]} : vector<6x16x128xbf16> to vector<1x16x128xbf16>
    %cst_10 = arith.constant 0.000000e+00 : f32
    %28 = arith.truncf %cst_10 : f32 to bf16
    %29 = vector.broadcast %28 : bf16 to vector<1x16x128xbf16>
    %30 = arith.select %26, %27, %29 : vector<1x16x128xbf16>
    %c3_i32 = arith.constant 3 : i32
    %31 = arith.cmpi slt, %arg1, %c3_i32 : i32
    %32 = vector.extract_strided_slice %25 {offsets = [5, 0, 0], sizes = [1, 16, 128], strides = [1, 1, 1]} : vector<6x16x128xbf16> to vector<1x16x128xbf16>
    %cst_11 = arith.constant 0.000000e+00 : f32
    %33 = arith.truncf %cst_11 : f32 to bf16
    %34 = vector.broadcast %33 : bf16 to vector<1x16x128xbf16>
    %35 = arith.select %31, %32, %34 : vector<1x16x128xbf16>
    %36 = vector.extract_strided_slice %25 {offsets = [1, 0, 0], sizes = [4, 16, 128], strides = [1, 1, 1]} : vector<6x16x128xbf16> to vector<4x16x128xbf16>
    %37 = tpu.concatenate %30, %36, %35 in 0 : vector<1x16x128xbf16>, vector<4x16x128xbf16>, vector<1x16x128xbf16> -> vector<6x16x128xbf16>
    %cst_12 = arith.constant 0.000000e+00 : bf16
    %38 = vector.broadcast %cst_12 : bf16 to vector<6x1x128xbf16>
    %39 = tpu.concatenate %38, %37, %38 in 1 : vector<6x1x128xbf16>, vector<6x16x128xbf16>, vector<6x1x128xbf16> -> vector<6x18x128xbf16>
    %40 = vector.extract_strided_slice %39 {offsets = [0, 0, 0], sizes = [6, 16, 128], strides = [1, 1, 1]} : vector<6x18x128xbf16> to vector<6x16x128xbf16>
    %41 = vector.extract_strided_slice %39 {offsets = [0, 1, 0], sizes = [6, 16, 128], strides = [1, 1, 1]} : vector<6x18x128xbf16> to vector<6x16x128xbf16>
    %42 = vector.extract_strided_slice %39 {offsets = [0, 2, 0], sizes = [6, 16, 128], strides = [1, 1, 1]} : vector<6x18x128xbf16> to vector<6x16x128xbf16>
    %43 = tpu.concatenate %40, %41, %42 in 2 : vector<6x16x128xbf16>, vector<6x16x128xbf16>, vector<6x16x128xbf16> -> vector<6x16x384xbf16>
    %44 = vector.shape_cast %43 : vector<6x16x384xbf16> to vector<96x384xbf16>
    %c0_13 = arith.constant 0 : index
    %c0_14 = arith.constant 0 : index
    %45 = vector.load %arg6[%c0_13, %c0_14] : memref<384x384xbf16, #tpu.memory_space<vmem>>, vector<384x384xbf16>
    %cst_15 = arith.constant dense<0.000000e+00> : vector<96x384xf32>
    %46 = tpu.matmul %44, %45, %cst_15 {dimension_numbers = #tpu.dot_dimension_numbers<[1], [0], [0], [1], [0, 0, 1, 1], [], []>} : vector<96x384xbf16>, vector<384x384xbf16>, vector<96x384xf32> -> vector<96x384xf32>
    %47 = vector.shape_cast %46 : vector<96x384xf32> to vector<6x16x384xf32>
    %48 = vector.extract_strided_slice %47 {offsets = [0, 0, 0], sizes = [4, 16, 128], strides = [1, 1, 1]} : vector<6x16x384xf32> to vector<4x16x128xf32>
    %49 = vector.extract_strided_slice %47 {offsets = [1, 0, 128], sizes = [4, 16, 128], strides = [1, 1, 1]} : vector<6x16x384xf32> to vector<4x16x128xf32>
    %50 = arith.addf %48, %49 : vector<4x16x128xf32>
    %51 = vector.extract_strided_slice %47 {offsets = [2, 0, 256], sizes = [4, 16, 128], strides = [1, 1, 1]} : vector<6x16x384xf32> to vector<4x16x128xf32>
    %52 = arith.addf %50, %51 : vector<4x16x128xf32>
    %c0_16 = arith.constant 0 : index
    %c0_17 = arith.constant 0 : index
    %53 = vector.load %arg7[%c0_16, %c0_17] : memref<1x128xf32, #tpu.memory_space<vmem>>, vector<1x128xf32>
    %54 = vector.shape_cast %53 : vector<1x128xf32> to vector<1x1x128xf32>
    %55 = vector.broadcast %54 : vector<1x1x128xf32> to vector<4x16x128xf32>
    %56 = arith.mulf %52, %55 : vector<4x16x128xf32>
    %c0_18 = arith.constant 0 : index
    %c0_19 = arith.constant 0 : index
    %57 = vector.load %arg8[%c0_18, %c0_19] : memref<1x128xf32, #tpu.memory_space<vmem>>, vector<1x128xf32>
    %58 = vector.shape_cast %57 : vector<1x128xf32> to vector<1x1x128xf32>
    %59 = vector.broadcast %58 : vector<1x1x128xf32> to vector<4x16x128xf32>
    %60 = arith.addf %56, %59 : vector<4x16x128xf32>
    %61 = vector.extract_strided_slice %1 {offsets = [2, 1, 0], sizes = [4, 16, 128], strides = [1, 1, 1]} : vector<8x18x128xbf16> to vector<4x16x128xbf16>
    %62 = vector.shape_cast %61 : vector<4x16x128xbf16> to vector<64x128xbf16>
    %c0_20 = arith.constant 0 : index
    %c0_21 = arith.constant 0 : index
    %63 = vector.load %arg9[%c0_20, %c0_21] : memref<128x128xbf16, #tpu.memory_space<vmem>>, vector<128x128xbf16>
    %cst_22 = arith.constant dense<0.000000e+00> : vector<64x128xf32>
    %64 = tpu.matmul %62, %63, %cst_22 {dimension_numbers = #tpu.dot_dimension_numbers<[1], [0], [0], [1], [0, 0, 1, 1], [], []>} : vector<64x128xbf16>, vector<128x128xbf16>, vector<64x128xf32> -> vector<64x128xf32>
    %c0_23 = arith.constant 0 : index
    %c0_24 = arith.constant 0 : index
    %65 = vector.load %arg10[%c0_23, %c0_24] : memref<1x128xf32, #tpu.memory_space<vmem>>, vector<1x128xf32>
    %66 = vector.broadcast %65 : vector<1x128xf32> to vector<64x128xf32>
    %67 = arith.mulf %64, %66 : vector<64x128xf32>
    %c0_25 = arith.constant 0 : index
    %c0_26 = arith.constant 0 : index
    %68 = vector.load %arg11[%c0_25, %c0_26] : memref<1x128xf32, #tpu.memory_space<vmem>>, vector<1x128xf32>
    %69 = vector.broadcast %68 : vector<1x128xf32> to vector<64x128xf32>
    %70 = arith.addf %67, %69 : vector<64x128xf32>
    %71 = vector.shape_cast %70 : vector<64x128xf32> to vector<4x16x128xf32>
    %72 = arith.addf %60, %71 : vector<4x16x128xf32>
    %cst_27 = arith.constant 0.000000e+00 : f32
    %73 = vector.broadcast %cst_27 : f32 to vector<4x16x128xf32>
    %74 = arith.maximumf %72, %73 : vector<4x16x128xf32>
    %75 = vector.shape_cast %74 : vector<4x16x128xf32> to vector<1x4x16x128xf32>
    %76 = arith.truncf %75 : vector<1x4x16x128xf32> to vector<1x4x16x128xbf16>
    %c0_28 = arith.constant 0 : index
    %c0_29 = arith.constant 0 : index
    %c0_30 = arith.constant 0 : index
    %c0_31 = arith.constant 0 : index
    %77 = vector.load %arg12[%c0_28, %c0_29, %c0_30, %c0_31] : memref<1x4x16x128xbf16, #tpu.memory_space<vmem>>, vector<1x4x16x128xbf16>
    tpu.vector_store %arg12[%c0_28, %c0_29, %c0_30, %c0_31], %76 {strides = array<i32>} : memref<1x4x16x128xbf16, #tpu.memory_space<vmem>>, vector<1x4x16x128xbf16>,
    return
  }
  func.func @transform_0(%arg0: i32, %arg1: i32) -> (i32, i32, i32, i32) {
    %c4_i32 = arith.constant 4 : i32
    %0 = arith.muli %arg0, %c4_i32 : i32
    %1 = arith.addi %0, %arg1 : i32
    %c0_i32 = arith.constant 0 : i32
    %c0_i32_0 = arith.constant 0 : i32
    %c0_i32_1 = arith.constant 0 : i32
    %c0_i32_2 = arith.constant 0 : i32
    return %1, %c0_i32, %c0_i32_0, %c0_i32_1 : i32, i32, i32, i32
  }
  func.func @transform_1(%arg0: i32, %arg1: i32) -> (i32, i32) {
    %c0_i32 = arith.constant 0 : i32
    %c0_i32_0 = arith.constant 0 : i32
    %c0_i32_1 = arith.constant 0 : i32
    return %c0_i32, %c0_i32_0 : i32, i32
  }
  func.func @transform_2(%arg0: i32, %arg1: i32) -> (i32, i32) {
    %c0_i32 = arith.constant 0 : i32
    %c0_i32_0 = arith.constant 0 : i32
    %c0_i32_1 = arith.constant 0 : i32
    return %c0_i32, %c0_i32_0 : i32, i32
  }
  func.func @transform_3(%arg0: i32, %arg1: i32) -> (i32, i32) {
    %c0_i32 = arith.constant 0 : i32
    %c0_i32_0 = arith.constant 0 : i32
    %c0_i32_1 = arith.constant 0 : i32
    return %c0_i32, %c0_i32_0 : i32, i32
  }
  func.func @transform_4(%arg0: i32, %arg1: i32) -> (i32, i32) {
    %c0_i32 = arith.constant 0 : i32
    %c0_i32_0 = arith.constant 0 : i32
    %c0_i32_1 = arith.constant 0 : i32
    return %c0_i32, %c0_i32_0 : i32, i32
  }
  func.func @transform_5(%arg0: i32, %arg1: i32) -> (i32, i32) {
    %c0_i32 = arith.constant 0 : i32
    %c0_i32_0 = arith.constant 0 : i32
    %c0_i32_1 = arith.constant 0 : i32
    return %c0_i32, %c0_i32_0 : i32, i32
  }
  func.func @transform_6(%arg0: i32, %arg1: i32) -> (i32, i32) {
    %c0_i32 = arith.constant 0 : i32
    %c0_i32_0 = arith.constant 0 : i32
    %c0_i32_1 = arith.constant 0 : i32
    return %c0_i32, %c0_i32_0 : i32, i32
  }
  func.func @transform_7(%arg0: i32, %arg1: i32) -> (i32, i32) {
    %c0_i32 = arith.constant 0 : i32
    %c0_i32_0 = arith.constant 0 : i32
    %c0_i32_1 = arith.constant 0 : i32
    return %c0_i32, %c0_i32_0 : i32, i32
  }
  func.func @transform_8(%arg0: i32, %arg1: i32) -> (i32, i32) {
    %c0_i32 = arith.constant 0 : i32
    %c0_i32_0 = arith.constant 0 : i32
    %c0_i32_1 = arith.constant 0 : i32
    return %c0_i32, %c0_i32_0 : i32, i32
  }
  func.func @transform_9(%arg0: i32, %arg1: i32) -> (i32, i32) {
    %c0_i32 = arith.constant 0 : i32
    %c0_i32_0 = arith.constant 0 : i32
    %c0_i32_1 = arith.constant 0 : i32
    return %c0_i32, %c0_i32_0 : i32, i32
  }
  func.func @transform_10(%arg0: i32, %arg1: i32) -> (i32, i32, i32, i32) {
    %c0_i32 = arith.constant 0 : i32
    %c0_i32_0 = arith.constant 0 : i32
    %c0_i32_1 = arith.constant 0 : i32
    return %arg0, %arg1, %c0_i32, %c0_i32_0 : i32, i32, i32, i32
  }
}

</mosaic_0001>

<bundles_post_ra>
// kernel: basic_block_forward.1
= control target key start
LH: loop header
LB: loop body
LE: loop exit
PB: predicated region body
PF: predicated region fallthrough
CT: control target
= control target key end

     0   :  { %s5606_s0 = inlined_call_operand.hbm [shape: bf16[8,8,18,128], index: 0, kind: input, shape index: {}]   ;;  %s5607_s1 = inlined_call_operand.hbm [shape: bf16[384,384], index: 1, kind: input, shape index: {}]   ;;  %s5608_s2 = inlined_call_operand.hbm [shape: f32[1,128], index: 2, kind: input, shape index: {}]   ;;  %s5609_s3 = inlined_call_operand.hbm [shape: f32[1,128], index: 3, kind: input, shape index: {}]   ;;  %s5610_s4 = inlined_call_operand.hbm [shape: bf16[384,384], index: 4, kind: input, shape index: {}]   ;;  %s5611_s5 = inlined_call_operand.hbm [shape: f32[1,128], index: 5, kind: input, shape index: {}]   ;;  %s5612_s6 = inlined_call_operand.hbm [shape: f32[1,128], index: 6, kind: input, shape index: {}]   ;;  %s5613_s7 = inlined_call_operand.hbm [shape: bf16[128,128], index: 7, kind: input, shape index: {}]   ;;  %s5614_s8 = inlined_call_operand.hbm [shape: f32[1,128], index: 8, kind: input, shape index: {}]   ;;  %s5615_s9 = inlined_call_operand.hbm [shape: f32[1,128], index: 9, kind: input, shape index: {}]   ;;  %s5616_s10 = inlined_call_operand.hbm [shape: bf16[2,16,16,128], index: 10, kind: output, shape index: {}]  }
   0x1   :  { %5635 = sst [smem:[#allocation34_spill]] %s5606_s0 }
   0x2   :  { %5636 = sst [smem:[#allocation35_spill]] %s5607_s1 }
   0x3   :  { %5637 = sst [smem:[#allocation36_spill]] %s5608_s2 }
   0x4   :  { %5638 = sst [smem:[#allocation37_spill]] %s5609_s3 }
   0x5   :  { %5639 = sst [smem:[#allocation38_spill]] %s5610_s4 }
   0x6   :  { %5640 = sst [smem:[#allocation39_spill]] %s5611_s5 }
   0x7   :  { %5641 = sst [smem:[#allocation40_spill]] %s5616_s10 }
   0x8   :  { %15 = vsyncpa [#allocation3], 0 }
   0x9   :  { %17 = vsyncpa [#allocation3 + $0x1], 0 }
   0xa   :  { %18 = vsyncpa [#allocation6], 0 }
   0xb   :  { %19 = vsyncpa [#allocation9], 0 }
   0xc   :  { %20 = vsyncpa [#allocation12], 0 }
   0xd   :  { %21 = vsyncpa [#allocation15], 0 }
   0xe   :  { %22 = vsyncpa [#allocation18], 0 }
   0xf   :  { %23 = vsyncpa [#allocation4], 0 }
  0x10   :  { %25 = vsyncpa [#allocation4 + $0x1], 0  ;;  %s4749_s13 = smov 0   ;;  %s4751_s14 = smov 0  }
  0x11   :  { %s4753_s15 = smov 0   ;;  %s4755_s16 = smov 0  }
  0x12   :  { %s4757_s17 = smov 0   ;;  %s4759_s18 = smov 0  }
  0x13   :  { %s4761_s19 = smov 0   ;;  %s4763_s20 = smov 0  }
  0x14   :  { %s4765_s21 = smov 0   ;;  %s4767_s22 = smov 0  }
  0x15   :  { %s4769_s23 = smov 0  }
  0x16 LB: > { %5642 = sst [smem:[#allocation27_spill]] %s4634_s13  ;;  %s5617_s24 = sadd.s32 4294967295, %s4674_s23   ;;  %s4674_s23 = sphi %s4769_s23, %s31_s23   ;;  %s4670_s22 = sphi %s4767_s22, %s5702_s22   ;;  %s4666_s21 = sphi %s4765_s21, %s5701_s21   ;;  %s4662_s20 = sphi %s4763_s20, %s5700_s20   ;;  %s4658_s19 = sphi %s4761_s19, %s5699_s19   ;;  %s4654_s18 = sphi %s4759_s18, %s5698_s18   ;;  %s4650_s17 = sphi %s4757_s17, %s5697_s17   ;;  %s4646_s16 = sphi %s4755_s16, %s5696_s16   ;;  %s4642_s15 = sphi %s4753_s15, %s5695_s15   ;;  %s4638_s14 = sphi %s4751_s14, %s5694_s14   ;;  %s4634_s13 = sphi %s4749_s13, %s5691_s13  }
  0x17   : > { %5643 = sst [smem:[#allocation28_spill]] %s4638_s14  ;;  %p3280_p0 = scmp.ge.s32.totalorder %s4674_s23, 1 }
  0x18   : > { %5644 = sst [smem:[#allocation29_spill]] %s4642_s15  ;;  %p4808_p1 = scmp.eq.s32.totalorder %s5617_s24, 0 }
  0x19   : > { %5645 = sst [smem:[#allocation30_spill]] %s4658_s19  ;;  %p295_p2 = scmp.lt.s32.totalorder %s4674_s23, 9 }
  0x1a   : > { %5646 = sst [smem:[#allocation31_spill]] %s4662_s20  ;;  %s4676_s27 = smov [#allocation5]  }
  0x1b   : > { %s5647_s25 = scalar_select %p4808_p1, 1, 0 }
  0x1c   : > { %p4813_p3 = pnand %p3280_p0, %p295_p2  ;;  %s307_s28 = sshll.u32 %s4676_s27, 4  ;;  %s4817_s28 = int_to_ptr.vmem [resolvable:$true] %s307_s28 }
  0x1d   : > { %5648 = sst [smem:[#allocation32_spill]] %s5647_s25  ;;  %s4677_s30 = smov [#allocation8]  }
  0x1e   : > { %s5649_s26 = scalar_select %p4813_p3, 1, 0 }
  0x1f   : > { %p3862_p4 = pneg %p4813_p3  ;;  %s332_s11 = sshll.u32 %s4677_s30, 4  ;;  %s4827_s11 = int_to_ptr.vmem [resolvable:$true] %s332_s11 }
  0x20   : > { %5650 = sst [smem:[#allocation33_spill]] %s5649_s26  ;;  %s4678_s12 = smov [#allocation11]  }
  0x21   : > { %p4823_p5 = pnand %p3862_p4, %p4808_p1  ;;  %s4829_s24 = sshll.u32 %s4678_s12, 4  ;;  %s357_s24 = int_to_ptr.vmem [resolvable:$true] %s4829_s24 }
  0x22   : > { %s5652_s1 = sld [smem:[#allocation35_spill]] }
  0x23   : > { %p4839_p7 = pneg %p4823_p5 }
  0x28   : > { %s4250_s27 = scalar_lea.hbm %s5652_s1, 9216 }
  0x29   : > { %p4251_p6 = scmp.ne.s32.totalorder %s5652_s1, %s4250_s27  ;;  %p4257_p10 = scmp.lt.u32.totalorder %s4250_s27, %s5652_s1 }
  0x2b   : > { %p4253_p8 = pnand %p4839_p7, %p4251_p6 }
  0x2d   : > { %p4254_p9 = pneg %p4253_p8 }
  0x2f   : > { %p4259_p11 = pnand %p4257_p10, %p4254_p9 }
  0x31   : > { %4262 = shalt.err (!%p4259_p11)
}
  0x32   : > { %s4263_s10 = scalar_lea.vmem %s4817_s28, 9216  ;;  %p4271_p2 = scmp.lt.s32.totalorder %s4817_s28, %s4817_s28 }
  0x33   : > { %p4264_p12 = scmp.ne.s32.totalorder %s4817_s28, %s4263_s10  ;;  %p4272_p4 = scmp.lt.s32.totalorder %s4263_s10, %s4263_s10 }
  0x35   : > { %p4266_p13 = pnand %p4264_p12, %p4839_p7  ;;  %p4273_p6 = por %p4272_p4, %p4271_p2 }
  0x37   : > { %p4267_p0 = pneg %p4266_p13 }
  0x39   : > { %p4274_p8 = pnand %p4273_p6, %p4267_p0 }
  0x3b   : > { %4277 = shalt.err (!%p4274_p8)
}
  0x3c   : > { %s5630_s19 = smov 192   ;;  %s5631_s20 = smov 12  }
  0x3d   : > { %3865 = dma.hbm_to_vmem [thread:$0]  (!%p4823_p5), %s5652_s1, 9216, %s4817_s28, [#allocation6], %s5630_s19, %s5630_s19, %s5631_s20  }
  0x3e   : > { %s5654_s3 = sld [smem:[#allocation37_spill]] }
  0x44   : > { %s4278_s10 = scalar_lea.hbm %s5654_s3, 16 }
  0x45   : > { %p4279_p9 = scmp.ne.s32.totalorder %s5654_s3, %s4278_s10  ;;  %p4285_p12 = scmp.lt.u32.totalorder %s4278_s10, %s5654_s3 }
  0x47   : > { %p4281_p10 = pnand %p4279_p9, %p4839_p7 }
  0x49   : > { %p4282_p11 = pneg %p4281_p10 }
  0x4b   : > { %p4287_p13 = pnand %p4285_p12, %p4282_p11 }
  0x4d   : > { %4290 = shalt.err (!%p4287_p13)
}
  0x4e   : > { %s4291_s28 = scalar_lea.vmem %s4827_s11, 16  ;;  %s4298_s13 = scalar_lea.vmem %s4827_s11, 32 }
  0x4f   : > { %p4292_p0 = scmp.ne.s32.totalorder %s4827_s11, %s4291_s28  ;;  %p4299_p6 = scmp.lt.s32.totalorder %s4827_s11, %s4827_s11 }
  0x50   : > { %p4300_p8 = scmp.lt.s32.totalorder %s4298_s13, %s4291_s28 }
  0x51   : > { %p4294_p2 = pnand %p4292_p0, %p4839_p7 }
  0x52   : > { %p4301_p9 = por %p4300_p8, %p4299_p6 }
  0x53   : > { %p4295_p4 = pneg %p4294_p2 }
  0x55   : > { %p4302_p10 = pnand %p4301_p9, %p4295_p4 }
  0x57   : > { %4305 = shalt.err (!%p4302_p10)
}
  0x58   : > { %3871 = dma.hbm_to_vmem [thread:$0]  (!%p4823_p5), %s5654_s3, 16, %s4827_s11, [#allocation9]  }
  0x59   : > { %s5655_s5 = sld [smem:[#allocation39_spill]] }
  0x5f   : > { %s4306_s27 = scalar_lea.hbm %s5655_s5, 16 }
  0x60   : > { %p4307_p11 = scmp.ne.s32.totalorder %s5655_s5, %s4306_s27  ;;  %p4313_p0 = scmp.lt.u32.totalorder %s4306_s27, %s5655_s5 }
  0x62   : > { %p4309_p12 = pnand %p4307_p11, %p4839_p7 }
  0x64   : > { %p4310_p13 = pneg %p4309_p12 }
  0x66   : > { %p4315_p2 = pnand %p4313_p0, %p4310_p13 }
  0x68   : > { %4318 = shalt.err (!%p4315_p2)
}
  0x69   : > { %s4319_s13 = scalar_lea.vmem %s357_s24, 16  ;;  %s4326_s11 = scalar_lea.vmem %s357_s24, 32 }
  0x6a   : > { %p4320_p4 = scmp.ne.s32.totalorder %s357_s24, %s4319_s13  ;;  %p4327_p9 = scmp.lt.s32.totalorder %s357_s24, %s357_s24 }
  0x6b   : > { %p4328_p10 = scmp.lt.s32.totalorder %s4326_s11, %s4319_s13 }
  0x6c   : > { %p4322_p6 = pnand %p4320_p4, %p4839_p7 }
  0x6d   : > { %p4329_p3 = por %p4328_p10, %p4327_p9 }
  0x6e   : > { %p4323_p8 = pneg %p4322_p6 }
  0x70   : > { %p4330_p1 = pnand %p4329_p3, %p4323_p8 }
  0x72   : > { %4333 = shalt.err (!%p4330_p1)
}
  0x73   : > { %3877 = dma.hbm_to_vmem [thread:$0]  (!%p4823_p5), %s5655_s5, 16, %s357_s24, [#allocation12]  }
  0x74   : > { %s4681_s25 = smov [#allocation14]   ;;  %s4334_s12 = scalar_lea.hbm %s5613_s7, 1024 }
  0x75   : > { %s377_s26 = sshll.u32 %s4681_s25, 4  ;;  %p4335_p11 = scmp.ne.s32.totalorder %s5613_s7, %s4334_s12  ;;  %s378_s26 = int_to_ptr.vmem [resolvable:$true] %s377_s26 }
  0x76   : > { %p4341_p12 = scmp.lt.u32.totalorder %s4334_s12, %s5613_s7 }
  0x77   : > { %p4337_p1 = pnand %p4335_p11, %p4839_p7 }
  0x79   : > { %p4338_p3 = pneg %p4337_p1 }
  0x7b   : > { %p4343_p13 = pnand %p4341_p12, %p4338_p3 }
  0x7d   : > { %4346 = shalt.err (!%p4343_p13)
}
  0x7e   : > { %s4347_s24 = scalar_lea.vmem %s378_s26, 1024  ;;  %p4355_p6 = scmp.lt.s32.totalorder %s378_s26, %s378_s26 }
  0x7f   : > { %p4348_p0 = scmp.ne.s32.totalorder %s378_s26, %s4347_s24  ;;  %p4356_p8 = scmp.lt.s32.totalorder %s4347_s24, %s4347_s24 }
  0x81   : > { %p4350_p2 = pnand %p4348_p0, %p4839_p7  ;;  %p4357_p9 = por %p4356_p8, %p4355_p6 }
  0x83   : > { %p4351_p4 = pneg %p4350_p2 }
  0x85   : > { %p4358_p10 = pnand %p4357_p9, %p4351_p4 }
  0x87   : > { %4361 = shalt.err (!%p4358_p10)
}
  0x88   : > { %s5632_s14 = smov 64   ;;  %s5633_s15 = smov 4  }
  0x89   : > { %3883 = dma.hbm_to_vmem [thread:$0]  (!%p4823_p5), %s5613_s7, 1024, %s378_s26, [#allocation15], %s5632_s14, %s5632_s14, %s5633_s15  }
  0x8a   : > { %s4684_s30 = smov [#allocation7]   ;;  %s4685_s10 = smov [#allocation10]  }
  0x8b   : > { %s321_s12 = sshll.u32 %s4684_s30, 4  ;;  %s342_s28 = sshll.u32 %s4685_s10, 4  ;;  %s322_s12 = int_to_ptr.vmem [resolvable:$true] %s321_s12  ;;  %s4927_s28 = int_to_ptr.vmem [resolvable:$true] %s342_s28 }
  0x8c   : > { %s5656_s2 = sld [smem:[#allocation36_spill]] }
  0x92   : > { %s4362_s24 = scalar_lea.hbm %s5656_s2, 16 }
  0x93   : > { %p4363_p11 = scmp.ne.s32.totalorder %s5656_s2, %s4362_s24  ;;  %p4369_p12 = scmp.lt.u32.totalorder %s4362_s24, %s5656_s2 }
  0x95   : > { %p4365_p1 = pnand %p4363_p11, %p4839_p7 }
  0x97   : > { %p4366_p3 = pneg %p4365_p1 }
  0x99   : > { %p4371_p13 = pnand %p4369_p12, %p4366_p3 }
  0x9b   : > { %4374 = shalt.err (!%p4371_p13)
}
  0x9c   : > { %s4375_s27 = scalar_lea.vmem %s322_s12, 16  ;;  %s4382_s30 = scalar_lea.vmem %s322_s12, 32 }
  0x9d   : > { %p4376_p0 = scmp.ne.s32.totalorder %s322_s12, %s4375_s27  ;;  %p4383_p6 = scmp.lt.s32.totalorder %s322_s12, %s322_s12 }
  0x9e   : > { %p4384_p8 = scmp.lt.s32.totalorder %s4382_s30, %s4375_s27 }
  0x9f   : > { %p4378_p2 = pnand %p4376_p0, %p4839_p7 }
  0xa0   : > { %p4385_p9 = por %p4384_p8, %p4383_p6 }
  0xa1   : > { %p4379_p4 = pneg %p4378_p2 }
  0xa3   : > { %p4386_p10 = pnand %p4385_p9, %p4379_p4 }
  0xa5   : > { %4389 = shalt.err (!%p4386_p10)
}
  0xa6   : > { %3868 = dma.hbm_to_vmem [thread:$0]  (!%p4823_p5), %s5656_s2, 16, %s322_s12, [#allocation6]  }
  0xa7   : > { %s5657_s4 = sld [smem:[#allocation38_spill]] }
  0xad   : > { %s4390_s11 = scalar_lea.hbm %s5657_s4, 9216 }
  0xae   : > { %p4391_p11 = scmp.ne.s32.totalorder %s5657_s4, %s4390_s11  ;;  %p4397_p12 = scmp.lt.u32.totalorder %s4390_s11, %s5657_s4 }
  0xb0   : > { %p4393_p1 = pnand %p4391_p11, %p4839_p7 }
  0xb2   : > { %p4394_p3 = pneg %p4393_p1 }
  0xb4   : > { %p4399_p13 = pnand %p4397_p12, %p4394_p3 }
  0xb6   : > { %4402 = shalt.err (!%p4399_p13)
}
  0xb7   : > { %s4403_s12 = scalar_lea.vmem %s4927_s28, 9216  ;;  %p4411_p6 = scmp.lt.s32.totalorder %s4927_s28, %s4927_s28 }
  0xb8   : > { %p4404_p0 = scmp.ne.s32.totalorder %s4927_s28, %s4403_s12  ;;  %p4412_p8 = scmp.lt.s32.totalorder %s4403_s12, %s4403_s12 }
  0xba   : > { %p4406_p2 = pnand %p4404_p0, %p4839_p7  ;;  %p4413_p9 = por %p4412_p8, %p4411_p6 }
  0xbc   : > { %p4407_p4 = pneg %p4406_p2 }
  0xbe   : > { %p4414_p10 = pnand %p4413_p9, %p4407_p4 }
  0xc0   : > { %4417 = shalt.err (!%p4414_p10)
}
  0xc1   : > { %s5658_s30 = smov 12   ;;  %s5659_s19 = smov 192  }
  0xc2   : > { %3874 = dma.hbm_to_vmem [thread:$0]  (!%p4823_p5), %s5657_s4, 9216, %s4927_s28, [#allocation9], %s5659_s19, %s5659_s19, %s5658_s30  }
  0xc3   : > { %s4686_s13 = smov [#allocation13]   ;;  %s4687_s24 = smov [#allocation16]  }
  0xc4   : > { %s367_s11 = sshll.u32 %s4686_s13, 4  ;;  %s391_s25 = sshll.u32 %s4687_s24, 4  ;;  %s368_s11 = int_to_ptr.vmem [resolvable:$true] %s367_s11  ;;  %s4973_s25 = int_to_ptr.vmem [resolvable:$true] %s391_s25 }
  0xc5   : > { %s4418_s12 = scalar_lea.hbm %s5612_s6, 16 }
  0xc6   : > { %p4419_p11 = scmp.ne.s32.totalorder %s5612_s6, %s4418_s12  ;;  %p4425_p12 = scmp.lt.u32.totalorder %s4418_s12, %s5612_s6 }
  0xc8   : > { %p4421_p1 = pnand %p4419_p11, %p4839_p7 }
  0xca   : > { %p4422_p3 = pneg %p4421_p1 }
  0xcc   : > { %p4427_p13 = pnand %p4425_p12, %p4422_p3 }
  0xce   : > { %4430 = shalt.err (!%p4427_p13)
}
  0xcf   : > { %s4431_s30 = scalar_lea.vmem %s368_s11, 16  ;;  %s4438_s19 = scalar_lea.vmem %s368_s11, 32 }
  0xd0   : > { %p4432_p0 = scmp.ne.s32.totalorder %s368_s11, %s4431_s30  ;;  %p4439_p6 = scmp.lt.s32.totalorder %s368_s11, %s368_s11 }
  0xd1   : > { %p4440_p8 = scmp.lt.s32.totalorder %s4438_s19, %s4431_s30 }
  0xd2   : > { %p4434_p2 = pnand %p4432_p0, %p4839_p7 }
  0xd3   : > { %p4441_p9 = por %p4440_p8, %p4439_p6 }
  0xd4   : > { %p4435_p4 = pneg %p4434_p2 }
  0xd6   : > { %p4442_p10 = pnand %p4441_p9, %p4435_p4 }
  0xd8   : > { %4445 = shalt.err (!%p4442_p10)
}
  0xd9   : > { %3880 = dma.hbm_to_vmem [thread:$0]  (!%p4823_p5), %s5612_s6, 16, %s368_s11, [#allocation12]  }
  0xda   : > { %s4446_s24 = scalar_lea.hbm %s5614_s8, 16 }
  0xdb   : > { %p4447_p11 = scmp.ne.s32.totalorder %s5614_s8, %s4446_s24  ;;  %p4453_p12 = scmp.lt.u32.totalorder %s4446_s24, %s5614_s8 }
  0xdd   : > { %p4449_p1 = pnand %p4447_p11, %p4839_p7 }
  0xdf   : > { %p4450_p3 = pneg %p4449_p1 }
  0xe1   : > { %p4455_p13 = pnand %p4453_p12, %p4450_p3 }
  0xe3   : > { %4458 = shalt.err (!%p4455_p13)
}
  0xe4   : > { %s4459_s11 = scalar_lea.vmem %s4973_s25, 16  ;;  %s4466_s28 = scalar_lea.vmem %s4973_s25, 32 }
  0xe5   : > { %p4460_p0 = scmp.ne.s32.totalorder %s4973_s25, %s4459_s11  ;;  %p4467_p6 = scmp.lt.s32.totalorder %s4973_s25, %s4973_s25 }
  0xe6   : > { %p4468_p8 = scmp.lt.s32.totalorder %s4466_s28, %s4459_s11 }
  0xe7   : > { %p4462_p2 = pnand %p4460_p0, %p4839_p7 }
  0xe8   : > { %p4469_p9 = por %p4468_p8, %p4467_p6 }
  0xe9   : > { %p4463_p4 = pneg %p4462_p2 }
  0xeb   : > { %p4470_p10 = pnand %p4469_p9, %p4463_p4 }
  0xed   : > { %4473 = shalt.err (!%p4470_p10)
}
  0xee   : > { %3886 = dma.hbm_to_vmem [thread:$0]  (!%p4823_p5), %s5614_s8, 16, %s4973_s25, [#allocation15]  }
  0xef   : > { %s4688_s14 = smov [#allocation17]   ;;  %s4474_s24 = scalar_lea.hbm %s5615_s9, 16 }
  0xf0   : > { %s402_s15 = sshll.u32 %s4688_s14, 4  ;;  %p4475_p11 = scmp.ne.s32.totalorder %s5615_s9, %s4474_s24  ;;  %s403_s15 = int_to_ptr.vmem [resolvable:$true] %s402_s15 }
  0xf1   : > { %p4481_p12 = scmp.lt.u32.totalorder %s4474_s24, %s5615_s9 }
  0xf2   : > { %p4477_p1 = pnand %p4475_p11, %p4839_p7 }
  0xf4   : > { %p4478_p3 = pneg %p4477_p1 }
  0xf6   : > { %p4483_p13 = pnand %p4481_p12, %p4478_p3 }
  0xf8   : > { %4486 = shalt.err (!%p4483_p13)
}
  0xf9   : > { %s4487_s25 = scalar_lea.vmem %s403_s15, 16  ;;  %s4494_s11 = scalar_lea.vmem %s403_s15, 32 }
  0xfa   : > { %p4488_p0 = scmp.ne.s32.totalorder %s403_s15, %s4487_s25  ;;  %p4495_p6 = scmp.lt.s32.totalorder %s403_s15, %s403_s15 }
  0xfb   : > { %p4496_p8 = scmp.lt.s32.totalorder %s4494_s11, %s4487_s25 }
  0xfc   : > { %p4490_p2 = pnand %p4488_p0, %p4839_p7 }
  0xfd   : > { %p4497_p9 = por %p4496_p8, %p4495_p6 }
  0xfe   : > { %p4491_p4 = pneg %p4490_p2 }
 0x100   : > { %p4498_p10 = pnand %p4497_p9, %p4491_p4 }
 0x102   : > { %4501 = shalt.err (!%p4498_p10)
}
 0x103   : > { %3889 = dma.hbm_to_vmem [thread:$0]  (!%p4823_p5), %s5615_s9, 16, %s403_s15, [#allocation18]  }
 0x104   : > { %s5660_s19 = sld [smem:[#allocation32_spill]]  ;;  %s40_s29 = sadd.s32 1, %s4666_s21 }
 0x105   : > { %s5661_s14 = sld [smem:[#allocation29_spill]]  ;;  %s43_s10 = sadd.s32 1, %s4670_s22 }
 0x106   : > { %p41_p7 = scmp.ge.s32.totalorder %s40_s29, 4  ;;  %s3278_s13 = sshll.u32 %s4670_s22, 2 }
 0x107   : > { %s5040_s24 = sadd.s32 %s4666_s21, %s3278_s13  ;;  %s54_s26 = sadd.s32 1, %s4654_s18 }
 0x108   : > { %s5704_s29 = smov (%p41_p7, %s40_s29), 0  ;;  %s5706_s10 = smov (!%p41_p7, %s43_s10), %s4670_s22 }
 0x109   : > { %p61_p11 = scmp.ne.s32.totalorder %s4654_s18, %s4650_s17  ;;  %s5662_s27 = sld [smem:[#allocation28_spill]] }
 0x10a   : > { %p62_p5 = scmp.eq.s32.totalorder %s4674_s23, 0  ;;  %p45_p1 = scmp.ge.s32.totalorder %s5706_s10, 2 }
 0x10b   : > { %p67_p3 = scmp.ne.s32.totalorder %s4650_s17, %s4646_s16  ;;  %s5664_s12 = sld [smem:[#allocation27_spill]] }
 0x10c   : > { %p5051_p12 = por %p62_p5, %p61_p11  ;;  %s267_s20 = ssub.s32 %s4666_s21, %s5704_s29 }
 0x10d   : > { %s5708_s10 = smov (%p45_p1, %s5706_s10), 0  ;;  %p5665_p13 = scmp.ne.s32.totalorder %s5660_s19, 0 }
 0x10e   : > { %s271_s16 = sadd.s32 1, %s5661_s14  ;;  %s3279_s11 = sshll.u32 %s5708_s10, 2 }
 0x10f   : > { %p5061_p0 = por %p5665_p13, %p67_p3  ;;  %s266_s28 = ssub.s32 %s4670_s22, %s5708_s10 }
 0x110   : > { %s50_s30 = sadd.s32 %s3279_s11, %s5704_s29  ;;  %s268_s13 = sor.u32 %s267_s20, %s266_s28 }
 0x111   : > { %s51_s0 = ssub.s32 %s5040_s24, %s50_s30  ;;  %p269_p2 = scmp.eq.s32.totalorder %s268_s13, 0 }
 0x112   : > { %p52_p4 = scmp.eq.s32.totalorder %s51_s0, 0  ;;  %p281_p6 = scmp.ne.s32.totalorder %s5661_s14, %s5662_s27 }
 0x113   : > { %s5710_s14 = smov (!%p269_p2, %s5661_s14), %s271_s16  ;;  %s5667_s1 = sadd.s32 4294967295, %s4674_s23  }
 0x114   : > { %s5077_s19 = scalar_select %p52_p4, %s4654_s18, %s54_s26  }
 0x115   : > { %p282_p8 = scmp.eq.s32.totalorder %s5667_s1, 7  ;;  %p287_p9 = scmp.ne.s32.totalorder %s5662_s27, %s5664_s12 }
 0x116   : > { %s5668_s2 = sadd.s32 4294967294, %s4674_s23   ;;  %p3907_p7 = scmp.lt.s32.totalorder %s4674_s23, 8 }
 0x117   : > { %p288_p10 = scmp.eq.s32.totalorder %s5668_s2, 7  ;;  %p5086_p11 = por %p282_p8, %p281_p6 }
 0x118   : > { %s413_s20 = sand.u32 1, %s4654_s18   ;;  %p5097_p1 = pnand %p3907_p7, %p5051_p12 }
 0x119   : > { %s5669_s3 = scalar_select %p5086_p11, 1, 0 }
 0x11a   : > { %p5091_p5 = por %p288_p10, %p287_p9  ;;  %s3819_s0 = smul.u32 96, %s413_s20 }
 0x11b   : > { %s3820_s1 = smul.u32 1536, %s5040_s24  ;;  %s5672_s12 = sld [smem:[#allocation34_spill]] }
 0x11c   : > { %s5670_s11 = scalar_select %p5091_p5, 1, 0 }
 0x11d   : > { %s417_s28 = scalar_lea.vmem [#allocation2], %s3819_s0  ;;  %s5109_s15 = scalar_lea.sflag [#allocation3], %s413_s20 }
 0x11e   : > { %s426_s30 = sshll.u32 %s417_s28, 4  ;;  %p4504_p12 = pneg %p5097_p1  ;;  %s5107_s30 = int_to_ptr.vmem [resolvable:$true] %s426_s30 }
 0x121   : > { %s5105_s16 = scalar_lea.hbm %s5672_s12, %s3820_s1  ;;  %s4507_s2 = scalar_lea.hbm %s5672_s12, 12288 }
 0x122   : > { %s4502_s13 = scalar_lea.hbm %s5105_s16, 1536  ;;  %p4508_p4 = scmp.lt.u32.totalorder %s5105_s16, %s5672_s12 }
 0x123   : > { %p4503_p3 = scmp.ne.s32.totalorder %s5105_s16, %s4502_s13  ;;  %p4509_p6 = scmp.lt.u32.totalorder %s4507_s2, %s4502_s13 }
 0x124   : > { %p4511_p9 = scmp.lt.u32.totalorder %s4502_s13, %s5105_s16 }
 0x125   : > { %p4505_p13 = pnand %p4504_p12, %p4503_p3  ;;  %p4510_p8 = por %p4509_p6, %p4508_p4 }
 0x127   : > { %p4506_p2 = pneg %p4505_p13  ;;  %p4512_p10 = por %p4511_p9, %p4510_p8 }
 0x129   : > { %p4513_p7 = pnand %p4512_p10, %p4506_p2 }
 0x12b   : > { %4516 = shalt.err (!%p4513_p7)
}
 0x12c   : > { %s4517_s20 = scalar_lea.vmem %s5107_s30, 1536  ;;  %s4689_s0 = smov [#allocation2]  }
 0x12d   : > { %p4518_p3 = scmp.ne.s32.totalorder %s5107_s30, %s4517_s20  ;;  %s4522_s28 = sshll.u32 %s4689_s0, 4  ;;  %s4523_s28 = int_to_ptr.vmem [resolvable:$false] %s4522_s28 }
 0x12e   : > { %s4524_s4 = scalar_lea.vmem %s4523_s28, 3072  ;;  %p4525_p11 = scmp.lt.s32.totalorder %s5107_s30, %s4523_s28 }
 0x12f   : > { %p4520_p13 = pnand %p4518_p3, %p4504_p12  ;;  %p4526_p4 = scmp.lt.s32.totalorder %s4524_s4, %s4517_s20 }
 0x131   : > { %p4521_p5 = pneg %p4520_p13  ;;  %p4527_p6 = por %p4526_p4, %p4525_p11 }
 0x133   : > { %p4528_p8 = pnand %p4527_p6, %p4521_p5 }
 0x135   : > { %4531 = shalt.err (!%p4528_p8)
}
 0x136   : > { %s5673_s13 = smov 4   ;;  %s5674_s24 = smov 64  }
 0x137   : > { %3893 = dma.hbm_to_vmem [thread:$0]  (!%p5097_p1), %s5105_s16, 1536, %s5107_s30, %s5109_s15, %s5674_s24, %s5674_s24, %s5673_s13  }
 0x138   : > { %s5675_s1 = sld [smem:[#allocation33_spill]] }
 0x13e   : > { %p5676_p12 = scmp.ne.s32.totalorder %s5675_s1, 0 }
 0x13f   : > { %s440_s2 = sand.u32 (!%p5676_p12), 1, %s4650_s17  }
 0x140   : > { %438 = sbr.rel (%p5676_p12) target bundleno = 1070 (0x42e), region = 60  ;;  %s441_s20 = scalar_lea.sflag (!%p5676_p12), [#allocation3], %s440_s2 }
 0x141   : > { %s3821_s27 = smul.u32 (!%p5676_p12), 96, %s440_s2 }
 0x143   : > { %s5143_s0 = scalar_lea.vmem (!%p5676_p12), [#allocation2], %s3821_s27 }
 0x147   : > { %4605 = dma.done.wait (%p5061_p0), %s441_s20, 1536  }
 0x148   : > { %4607 = vsyncadd (%p5061_p0), %s441_s20, 4294965760  ;;  %s5677_s26 = sld [smem:[#allocation32_spill]] }
 0x14e   : > { %p5678_p11 = scmp.ne.s32.totalorder %s5677_s26, 0 }
 0x150   : > { %4609 = dma.done.wait (%p5678_p11), [#allocation6], 9232  }
 0x151   : > { %4611 = vsyncadd (%p5678_p11), [#allocation6], 4294958064 }
 0x152   : > { %4613 = dma.done.wait (%p5678_p11), [#allocation9], 9232  }
 0x153   : > { %4615 = vsyncadd (%p5678_p11), [#allocation9], 4294958064 }
 0x154   : > { %4617 = dma.done.wait (%p5678_p11), [#allocation12], 32  }
 0x155   : > { %4619 = vsyncadd (%p5678_p11), [#allocation12], 4294967264 }
 0x156   : > { %4621 = dma.done.wait (%p5678_p11), [#allocation15], 1040  }
 0x157   : > { %4623 = vsyncadd (%p5678_p11), [#allocation15], 4294966256 }
 0x158   : > { %4625 = dma.done.wait (%p5678_p11), [#allocation18], 16  }
 0x159   : > { %4627 = vsyncadd (%p5678_p11), [#allocation18], 4294967280  ;;  %v4022_v0 = vld [vmem:[#allocation5 + $0x4] ss:$12 sps:$4 sm:$0xff]   ;;  %v4024_v1 = vld [vmem:[#allocation5 + $0xc8] ss:$12 sps:$4 sm:$0xff]  }
 0x15a   : > { %1235 = vmatprep.subr.bf16.mxu0 %v4022_v0  ;;  %v4025_v2 = vld [vmem:[#allocation5] ss:$12 sps:$4 sm:$0xff]   ;;  %3529 = vmatprep.subr.bf16.mxu1 %v4024_v1  ;;  %v4026_v3 = vld [vmem:[#allocation5 + $0x8] ss:$12 sps:$4 sm:$0xff]   ;;  %v4030_v6 = vld [vmem:[#allocation5 + $0x18] ss:$12 sps:$4 sm:$0xff]  }
 0x15b   : > { %1236 = vmatpush1.bf16.msra.mxu0 %v4025_v2  ;;  %v4027_v4 = vld [vmem:[#allocation5 + $0x1c] ss:$12 sps:$4 sm:$0xff]   ;;  %3530 = vmatpush3.bf16.msra.mxu1 %v4026_v3  ;;  %v4029_v5 = vld [vmem:[#allocation5 + $0xe0] ss:$12 sps:$4 sm:$0xff]   ;;  %v4034_v9 = vld [vmem:[#allocation5 + $0xf8] ss:$12 sps:$4 sm:$0xff]  }
 0x15c   : > { %1237 = vmatprep.subr.bf16.mxu0 %v4027_v4  ;;  %v4031_v7 = vld [vmem:[#allocation5 + $0x20] ss:$12 sps:$4 sm:$0xff]   ;;  %3531 = vmatprep.subr.bf16.mxu1 %v4029_v5  ;;  %v4035_v10 = vld [vmem:[#allocation5 + $0x30] ss:$12 sps:$4 sm:$0xff]   ;;  %v4036_v11 = vld [vmem:[#allocation5 + $0x38] ss:$12 sps:$4 sm:$0xff]  }
 0x15d   : > { %v4032_v8 = vld [vmem:[#allocation5 + $0x34] ss:$12 sps:$4 sm:$0xff]   ;;  %v4037_v12 = vld [vmem:[#allocation5 + $0x4c] ss:$12 sps:$4 sm:$0xff]   ;;  %v4039_v13 = vld [vmem:[#allocation5 + $0x110] ss:$12 sps:$4 sm:$0xff]  }
 0x15e   : > { %v4040_v14 = vld [vmem:[#allocation5 + $0x48] ss:$12 sps:$4 sm:$0xff]   ;;  %v4041_v15 = vld [vmem:[#allocation5 + $0x50] ss:$12 sps:$4 sm:$0xff]   ;;  %v4045_v18 = vld [vmem:[#allocation5 + $0x60] ss:$12 sps:$4 sm:$0xff]  }
 0x15f   : > { %1238 = vmatpush1.bf16.msra.mxu0 %v4030_v6  ;;  %3532 = vmatpush3.bf16.msra.mxu1 %v4031_v7  ;;  %v4042_v16 = vld [vmem:[#allocation5 + $0x64] ss:$12 sps:$4 sm:$0xff]   ;;  %v4044_v17 = vld [vmem:[#allocation5 + $0x128] ss:$12 sps:$4 sm:$0xff]   ;;  %v4049_v21 = vld [vmem:[#allocation5 + $0x140] ss:$12 sps:$4 sm:$0xff]  }
 0x160   : > { %1239 = vmatprep.subr.bf16.mxu0 %v4032_v8  ;;  %3533 = vmatprep.subr.bf16.mxu1 %v4034_v9  ;;  %v4046_v19 = vld [vmem:[#allocation5 + $0x68] ss:$12 sps:$4 sm:$0xff]   ;;  %v4050_v22 = vld [vmem:[#allocation5 + $0x78] ss:$12 sps:$4 sm:$0xff]   ;;  %v4051_v23 = vld [vmem:[#allocation5 + $0x80] ss:$12 sps:$4 sm:$0xff]  }
 0x161   : > { %v4047_v20 = vld [vmem:[#allocation5 + $0x7c] ss:$12 sps:$4 sm:$0xff]   ;;  %v4052_v24 = vld [vmem:[#allocation5 + $0x94] ss:$12 sps:$4 sm:$0xff]   ;;  %v4054_v25 = vld [vmem:[#allocation5 + $0x158] ss:$12 sps:$4 sm:$0xff]  }
 0x162   : > { %v4055_v26 = vld [vmem:[#allocation5 + $0x90] ss:$12 sps:$4 sm:$0xff]   ;;  %v4056_v27 = vld [vmem:[#allocation5 + $0x98] ss:$12 sps:$4 sm:$0xff]   ;;  %vm617_vm0 = vsmask.f32 7424 }
 0x163   : > { %1240 = vmatpush1.bf16.msra.mxu0 %v4035_v10  ;;  %3534 = vmatpush3.bf16.msra.mxu1 %v4036_v11  ;;  %v4057_v28 = vld [vmem:[#allocation5 + $0xac] ss:$12 sps:$4 sm:$0xff]   ;;  %v4059_v29 = vld [vmem:[#allocation5 + $0x170] ss:$12 sps:$4 sm:$0xff]   ;;  %v4060_v30 = vld [vmem:[#allocation5 + $0xa8] ss:$12 sps:$4 sm:$0xff]  }
 0x164   : > { %1241 = vmatprep.subr.bf16.mxu0 %v4037_v12  ;;  %3535 = vmatprep.subr.bf16.mxu1 %v4039_v13  ;;  %v5170_v31 = vld [vmem:[%s5143_s0] sm:$0xff]   ;;  %v5173_v32 = vld [vmem:[%s5143_s0 + $0x8] ss:$0 sps:$4 sm:$0x11]   ;;  %v4061_v33 = vld [vmem:[#allocation5 + $0xb0] ss:$12 sps:$4 sm:$0xff]  }
 0x165   : > { %v619_v34 = vshrl.u32 %v5170_v31, 16  ;;  %v621_v35 = vshll.u32 %v5170_v31, 16  ;;  %v4064_v36 = vld [vmem:[#allocation5 + $0xc4] ss:$12 sps:$4 sm:$0xff]   ;;  %v626_v37 = vshll.u32 %v5173_v32, 16  ;;  %vm722_vm1 = vcmask 1046528  }
 0x166   : > { %v4066_v38 = vld [vmem:[#allocation5 + $0xc0] ss:$12 sps:$4 sm:$0xff]   ;;  %v4067_v40 = vld [vmem:[#allocation5 + $0xdc] ss:$12 sps:$4 sm:$0xff]   ;;  %v4069_v50 = vld [vmem:[#allocation5 + $0xd8] ss:$12 sps:$4 sm:$0xff]  }
 0x167   : > { %1242 = vmatpush1.bf16.msra.mxu0 %v4040_v14  ;;  %3536 = vmatpush3.bf16.msra.mxu1 %v4041_v15  ;;  %v623_v39 = vrot.slane %v621_v35, 1  ;;  %v5179_v41 = vld [vmem:[%s5143_s0 + $0xc] sm:$0xff]   ;;  %v628_v42 = vrot.slane %v626_v37, 1  ;;  %v4071_v44 = vld [vmem:[%s5143_s0 + $0x14] ss:$0 sps:$4 sm:$0x11]  }
 0x168   : > { %1243 = vmatprep.subr.bf16.mxu0 %v4042_v16  ;;  %3537 = vmatprep.subr.bf16.mxu1 %v4044_v17  ;;  %v631_v45 = vshrl.u32 %v5179_v41, 16  ;;  %v633_v46 = vshll.u32 %v5179_v41, 16  ;;  %v638_v49 = vshll.u32 %v4071_v44, 16  ;;  %v527_v51 = vld [vmem:[%s5143_s0 + $0x18] sm:$0xf]  ;;  %v726_v59 = vrot.slane %v5179_v41, 1 }
 0x169   : > { %v624_v43 = vor.u32 %v623_v39, %v619_v34  ;;  %v528_v52 = vld [vmem:[%s5143_s0 + $0x1c] sm:$0xf]  ;;  %v4072_v55 = vld [vmem:[#allocation5 + $0xf4] ss:$12 sps:$4 sm:$0xff]   ;;  %v727_v60 = vrot.slane %v4071_v44, 1  ;;  %s5679_s25 = sld [smem:[#allocation30_spill]] }
 0x16a   : > { %v635_v48 = vrot.slane %v633_v46, 1  ;;  %v640_v54 = vrot.slane %v638_v49, 1  ;;  %v529_v56 = vld [vmem:[%s5143_s0 + $0x20] sm:$0x1]  ;;  %v5189_v57 = vcombine.low %v527_v51, %v528_v52  ;;  %v4074_v62 = vld [vmem:[#allocation5 + $0xf0] ss:$12 sps:$4 sm:$0xff]  }
 0x16b   : > { %1244 = vmatpush1.bf16.msra.mxu0 %v4045_v18  ;;  %3538 = vmatpush3.bf16.msra.mxu1 %v4046_v19  ;;  %v629_v47 = vsel %vm617_vm0, %v624_v43, %v628_v42  ;;  %v5191_v58 = vcombine.low %v529_v56, %v529_v56  ;;  %v530_v2 = vld [vmem:[%s5143_s0 + $0x24] sm:$0xf]  ;;  %v531_v3 = vld [vmem:[%s5143_s0 + $0x28] sm:$0xf]  ;;  %v5204_v4 = vsel %vm722_vm1, %v726_v59, %v727_v60  ;;  %v4075_v5 = vld [vmem:[#allocation5 + $0x10c] ss:$12 sps:$4 sm:$0xff]  }
 0x16c   : > { %1245 = vmatprep.subr.bf16.mxu0 %v4047_v20  ;;  %3539 = vmatprep.subr.bf16.mxu1 %v4049_v21  ;;  %v636_v53 = vor.u32 %v635_v48, %v631_v45  ;;  %v643_v63 = vshrl.u32 %v5189_v57, 16  ;;  %v645_v0 = vshll.u32 %v5189_v57, 16  ;;  %v532_v7 = vld [vmem:[%s5143_s0 + $0x2c] sm:$0x1]  ;;  %v5207_v8 = vcombine.low %v530_v2, %v531_v3  ;;  %v4077_v11 = vld [vmem:[#allocation5 + $0x108] ss:$12 sps:$4 sm:$0xff]  }
 0x16d   : > { %1477 = vmatprep.mubr.bf16.mxu1 %v629_v47  ;;  %1267 = vmatprep.mubr.bf16.mxu0 %v629_v47  ;;  %v650_v1 = vshll.u32 %v5191_v58, 16  ;;  %v5209_v10 = vcombine.low %v532_v7, %v532_v7  ;;  %v4080_v13 = vld [vmem:[#allocation5 + $0x124] ss:$12 sps:$4 sm:$0xff]   ;;  %v534_v18 = vld [vmem:[%s5143_s0 + $0x34] sm:$0xf]  ;;  %vm1775_vm3 = vcmask 1040384  }
 0x16e   : > { %v5195_v61 = vsel %vm617_vm0, %v636_v53, %v640_v54  ;;  %v647_v6 = vrot.slane %v645_v0, 1  ;;  %v655_v14 = vshrl.u32 %v5207_v8, 16  ;;  %v657_v15 = vshll.u32 %v5207_v8, 16  ;;  %v533_v17 = vld [vmem:[%s5143_s0 + $0x30] sm:$0xf]  ;;  %v5244_v54 = vld [vmem:[%s5143_s0 + $0x48] sm:$0xff]  }
 0x16f   : > { %1246 = vmatpush1.bf16.msra.mxu0 %v4050_v22  ;;  %3540 = vmatpush3.bf16.msra.mxu1 %v4051_v23  ;;  %v652_v9 = vrot.slane %v650_v1, 1  ;;  %v662_v16 = vshll.u32 %v5209_v10, 16  ;;  %v535_v21 = vld [vmem:[%s5143_s0 + $0x38] sm:$0x1]  ;;  %v5221_v22 = vcombine.low %v533_v17, %v534_v18  ;;  %v4082_v23 = vld [vmem:[#allocation5 + $0x120] ss:$12 sps:$4 sm:$0xff]  }
 0x170   : > { %1247 = vmatprep.subr.bf16.mxu0 %v4052_v24  ;;  %3541 = vmatprep.subr.bf16.mxu1 %v4054_v25  ;;  %v648_v12 = vor.u32 %v647_v6, %v643_v63  ;;  %v659_v20 = vrot.slane %v657_v15, 1  ;;  %v536_v34 = vld [vmem:[%s5143_s0 + $0x3c] sm:$0xf]  ;;  %v537_v35 = vld [vmem:[%s5143_s0 + $0x40] sm:$0xf]  ;;  %v693_v2 = vshll.u32 %v5244_v54, 16 }
 0x171   : > { %v664_v25 = vrot.slane %v662_v16, 1  ;;  %v5235_v42 = vcombine.low %v536_v34, %v537_v35  ;;  %v4106_v43 = vld [vmem:[#allocation5 + $0x1b8] ss:$12 sps:$4 sm:$0xff]   ;;  %v4088_v44 = vld [vmem:[#allocation5 + $0x154] ss:$12 sps:$4 sm:$0xff]   ;;  %p1711_p0 = scmp.gt.s32.totalorder %s5679_s25, 0 }
 0x172   : > { %v5218_v19 = vsel %vm617_vm0, %v648_v12, %v652_v9  ;;  %v660_v24 = vor.u32 %v659_v20, %v655_v14  ;;  %v4090_v49 = vld [vmem:[#allocation5 + $0x150] ss:$12 sps:$4 sm:$0xff]   ;;  %v4091_v51 = vld [vmem:[#allocation5 + $0x16c] ss:$12 sps:$4 sm:$0xff]   ;;  %v4093_v52 = vld [vmem:[#allocation5 + $0x168] ss:$12 sps:$4 sm:$0xff]  }
 0x173   : > { %1248 = vmatpush1.bf16.msra.mxu0 %v4055_v26  ;;  %3542 = vmatpush3.bf16.msra.mxu1 %v4056_v27  ;;  %v5224_v26 = vcombine.low %v535_v21, %v535_v21  ;;  %v669_v27 = vshll.u32 %v5221_v22, 16  ;;  %v681_v48 = vshll.u32 %v5235_v42, 16  ;;  %v679_v53 = vshrl.u32 %v5235_v42, 16  ;;  %v4098_v60 = vld [vmem:[#allocation5 + $0x184] ss:$12 sps:$4 sm:$0xff]   ;;  %v5263_v14 = vld [vmem:[%s5143_s0 + $0x54] sm:$0xff]  }
 0x174   : > { %1249 = vmatprep.subr.bf16.mxu0 %v4057_v28  ;;  %3543 = vmatprep.subr.bf16.mxu1 %v4059_v29  ;;  %v4099_v28 = vld [vmem:[#allocation5 + $0x188] ss:$12 sps:$4 sm:$0xff]   ;;  %v5231_v37 = vsel %vm617_vm0, %v660_v24, %v664_v25  ;;  %v5253_v63 = vld [vmem:[%s5143_s0 + $0x50] ss:$0 sps:$4 sm:$0x11]   ;;  %v695_v12 = vrot.slane %v693_v2, 1 }
 0x175   : > { %v4083_v29 = vld [vmem:[#allocation5 + $0x13c] ss:$12 sps:$4 sm:$0xff]   ;;  %v674_v39 = vshll.u32 %v5224_v26, 16  ;;  %v683_v56 = vrot.slane %v681_v48, 1  ;;  %v4096_v3 = vld [vmem:[#allocation5 + $0x180] ss:$12 sps:$4 sm:$0xff]  }
 0x176   : > { %v4103_v6 = vld [vmem:[#allocation5 + $0x198] ss:$12 sps:$4 sm:$0xff]   ;;  %v4114_v7 = vld [vmem:[#allocation5 + $0x200] ss:$12 sps:$4 sm:$0xff]   ;;  %v4110_v17 = vld [vmem:[#allocation5 + $0x1b0] ss:$12 sps:$4 sm:$0xff]  }
 0x177   : > { %1250 = vmatpush1.bf16.msra.mxu0 %v4060_v30  ;;  %3544 = vmatpush3.bf16.msra.mxu1 %v4061_v33  ;;  %v4100_v30 = vld [vmem:[#allocation5 + $0x1a0] ss:$12 sps:$4 sm:$0xff]   ;;  %v667_v33 = vshrl.u32 %v5221_v22, 16  ;;  %v676_v46 = vrot.slane %v674_v39, 1  ;;  %v684_v0 = vor.u32 %v683_v56, %v679_v53  ;;  %v4120_v15 = vld [vmem:[#allocation5 + $0x218] ss:$12 sps:$4 sm:$0xff]  }
 0x178   : > { %1251 = vmatprep.subr.bf16.mxu0 %v4064_v36  ;;  %3687 = vmatprep.subr.bf16.mxu1 %v4099_v28  ;;  %v4085_v36 = vld [vmem:[#allocation5 + $0x138] ss:$12 sps:$4 sm:$0xff]   ;;  %v4112_v16 = vld [vmem:[#allocation5 + $0x1b4] ss:$12 sps:$4 sm:$0xff]   ;;  %v741_v53 = vrot.slane %v5244_v54, 1  ;;  %v744_v56 = vrot.slane %v5263_v14, 1 }
 0x179   : > { %v5269_v18 = vld [vmem:[%s5143_s0 + $0x5c] ss:$0 sps:$4 sm:$0x11]   ;;  %v4119_v24 = vld [vmem:[#allocation5 + $0x1cc] ss:$12 sps:$4 sm:$0xff]   ;;  %p1716_p5 = scmp.lt.s32.totalorder %s5679_s25, 3 }
 0x17a   : > { %1478 = vmatmul.mubr.bf16.vlgmr.msra.gmra.mrb[0].mxu1 %v5170_v31  ;;  %v710_v25 = vshll.u32 %v5269_v18, 16  ;;  %v4122_v35 = vld [vmem:[#allocation5 + $0x1e0] ss:$12 sps:$4 sm:$0xff]   ;;  %s1712_s16 = scalar_select %p1711_p0, 1, 0 }
 0x17b   : > { %1252 = vmatpush1.bf16.msra.mxu0 %v4066_v38  ;;  %1483 = vmatprep.mubr.bf16.mxu1 %v5195_v61  ;;  %v671_v38 = vrot.slane %v669_v27, 1  ;;  %v4117_v27 = vld [vmem:[#allocation5 + $0x1c8] ss:$12 sps:$4 sm:$0xff]   ;;  %v4143_v2 = vld [vmem:[#allocation10 + $0x48] ss:$12 sps:$4 sm:$0xff]   ;;  %s5684_s15 = sld [smem:[#allocation28_spill]] }
 0x17c   : > { %1253 = vmatprep.subr.bf16.mxu0 %v4067_v40  ;;  %3688 = vmatpush3.bf16.msra.mxu1 %v4099_v28  ;;  %v538_v40 = vld [vmem:[%s5143_s0 + $0x44] sm:$0x1]  ;;  %v712_v34 = vrot.slane %v710_v25, 1  ;;  %v4168_v25 = vld [vmem:[#allocation10 + $0xf0] ss:$12 sps:$4 sm:$0xff]   ;;  %s5685_s13 = sld [smem:[#allocation31_spill]] }
 0x17d   : > { %3689 = vmatprep.subr.bf16.mxu1 %v4100_v30  ;;  %v672_v45 = vor.u32 %v671_v38, %v667_v33  ;;  %v5239_v47 = vcombine.low %v538_v40, %v538_v40  ;;  %v4124_v33 = vld [vmem:[#allocation5 + $0x1e4] ss:$12 sps:$4 sm:$0xff]   ;;  %v4130_v40 = vld [vmem:[#allocation5 + $0x214] ss:$12 sps:$4 sm:$0xff]   ;;  %vm1776_vm4 = vsmask.f32 256 }
 0x17e   : > { %v4125_v38 = vld [vmem:[#allocation5 + $0x1f8] ss:$12 sps:$4 sm:$0xff]   ;;  %vm5353_vm5 = vmand %vm1775_vm3, %vm1776_vm4  ;;  %s5419_s30 = scalar_select %p1716_p5, 1, 0  ;;  %vm2754_vm7 = vsmask.f32 3328 }
 0x17f   : > { %1254 = vmatpush1.bf16.msra.mxu0 %v4069_v50  ;;  %v4107_v50 = vld [vmem:[#allocation5 + $0x1d0] ss:$12 sps:$4 sm:$0xff]   ;;  %v686_v59 = vshll.u32 %v5239_v47, 16  ;;  %vm2755_vm8 = vsmask.f32 7440  ;;  %s3505_s24 = sshll.u32 %s5679_s25, 3 }
 0x180   : > { %1255 = vmatprep.subr.bf16.mxu0 %v4072_v55  ;;  %3690 = vmatpush3.bf16.msra.mxu1 %v4100_v30  ;;  %v5247_v55 = vsel %vm617_vm0, %v672_v45, %v676_v46  ;;  %v4133_v45 = vld [vmem:[#allocation5 + $0x22c] ss:$12 sps:$4 sm:$0xff]   ;;  %v4131_v46 = vld [vmem:[#allocation5 + $0x228] ss:$12 sps:$4 sm:$0xff]   ;;  %vm5503_vm9 = vmor %vm2754_vm7, %vm2755_vm8  ;;  %p5688_p2 = scmp.ne.s32.totalorder %s5669_s3, 0 }
 0x181   : > { %3691 = vmatprep.subr.bf16.mxu1 %v4106_v43  ;;  %v688_v1 = vrot.slane %v686_v59, 1  ;;  %v745_v59 = vrot.slane %v5269_v18, 1  ;;  %v4165_v18 = vld [vmem:[#allocation10 + $0xdc] ss:$12 sps:$4 sm:$0xff]   ;;  %s514_s28 = sand.u32 1, %s5684_s15  }
 0x182   : > { %1484 = vmatmul.mubr.bf16.gmra.mrb[4].mxu1 %v5179_v41  ;;  %s3303_s4 = sshll.u32 %s514_s28, 5  ;;  %s3493_s1 = sshll.u32 %s5685_s13, 5 }
 0x183   : > { %1256 = vmatpush1.bf16.msra.mxu0 %v4074_v62  ;;  %1489 = vmatprep.mubr.bf16.mxu1 %v5218_v19  ;;  %v4113_v62 = vld [vmem:[#allocation5 + $0x1e8] ss:$12 sps:$4 sm:$0xff]   ;;  %v5258_v9 = vsel %vm617_vm0, %v684_v0, %v688_v1  ;;  %v4145_v1 = vld [vmem:[#allocation10 + $0x4c] ss:$12 sps:$4 sm:$0xff]   ;;  %s516_s2 = scalar_lea.vmem [#allocation19], %s3303_s4  ;;  %s3098_s27 = sadd.s32 %s3505_s24, %s3493_s1 }
 0x184   : > { %1257 = vmatprep.subr.bf16.mxu0 %v4075_v5  ;;  %3692 = vmatpush3.bf16.msra.mxu1 %v4106_v43  ;;  %v4105_v5 = vld [vmem:[#allocation5 + $0x19c] ss:$12 sps:$4 sm:$0xff]   ;;  %v724_v43 = vrot.slane %v5173_v32, 1  ;;  %v730_v32 = vrot.slane %v5191_v58, 1  ;;  %v4140_v0 = vld [vmem:[#allocation10 + $0x30] ss:$12 sps:$4 sm:$0xff]  }
 0x185   : > { %3693 = vmatprep.subr.bf16.mxu1 %v4107_v50  ;;  %s3101_s20 = sshll.u32 %s516_s2, 4  ;;  %s5545_s13 = scalar_lea.sflag [#allocation4], %s514_s28  ;;  %s5536_s20 = int_to_ptr.vmem [resolvable:$true] %s3101_s20 }
 0x186   : > { %s4532_s24 = scalar_lea.vmem %s5536_s20, 512  ;;  %s4691_s1 = smov [#allocation19]  }
 0x187   : > { %1258 = vmatpush1.bf16.msra.mxu0 %v4077_v11  ;;  %v691_v11 = vshrl.u32 %v5244_v54, 16  ;;  %p4533_p1 = scmp.ne.s32.totalorder %s5536_s20, %s4532_s24 }
 0x188   : > { %1259 = vmatprep.subr.bf16.mxu0 %v4080_v13  ;;  %3694 = vmatpush3.bf16.msra.mxu1 %v4107_v50  ;;  %v698_v13 = vshll.u32 %v5253_v63, 16  ;;  %v733_v50 = vrot.slane %v5209_v10, 1  ;;  %v739_v10 = vrot.slane %v5239_v47, 1  ;;  %v4690_v47 = vmov 0  }
 0x189   : > { %3695 = vmatprep.subr.bf16.mxu1 %v4113_v62  ;;  %v696_v20 = vor.u32 %v695_v12, %v691_v11  ;;  %v4154_v11 = vld [vmem:[#allocation10 + $0x94] ss:$12 sps:$4 sm:$0xff]   ;;  %p4534_p9 = pnand %p4533_p1, %p5688_p2 }
 0x18a   : > { %1490 = vmatmul.mubr.bf16.gmra.mrb[8].mxu1 %v5189_v57  ;;  %v700_v21 = vrot.slane %v698_v13, 1  ;;  %v4155_v12 = vld [vmem:[#allocation10 + $0xa8] ss:$12 sps:$4 sm:$0xff]   ;;  %v4157_v13 = vld [vmem:[#allocation10 + $0xac] ss:$12 sps:$4 sm:$0xff]  }
 0x18b   : > { %1260 = vmatpush1.bf16.msra.mxu0 %v4082_v23  ;;  %1497 = vmatprep.mubr.bf16.mxu1 %v5231_v37  ;;  %v705_v23 = vshll.u32 %v5263_v14, 16  ;;  %p4535_p10 = pneg %p4534_p9 }
 0x18c   : > { %1261 = vmatprep.subr.bf16.mxu0 %v4083_v29  ;;  %3696 = vmatpush3.bf16.msra.mxu1 %v4113_v62  ;;  %v701_v28 = vsel %vm617_vm0, %v696_v20, %v700_v21  ;;  %v703_v29 = vshrl.u32 %v5263_v14, 16  ;;  %v4137_v62 = vld [vmem:[#allocation10 + $0x18] ss:$12 sps:$4 sm:$0xff]   ;;  %v4166_v20 = vld [vmem:[#allocation10 + $0xe0] ss:$12 sps:$4 sm:$0xff]  }
 0x18d   : > { %3697 = vmatprep.subr.bf16.mxu1 %v4114_v7  ;;  %v707_v30 = vrot.slane %v705_v23, 1  ;;  %v4163_v21 = vld [vmem:[#allocation10 + $0xd8] ss:$12 sps:$4 sm:$0xff]   ;;  %v4167_v23 = vld [vmem:[#allocation10 + $0x20] ss:$12 sps:$4 sm:$0xff]  }
 0x18f   : > { %1262 = vmatpush1.bf16.msra.mxu0 %v4085_v36  ;;  %v708_v36 = vor.u32 %v707_v30, %v703_v29  ;;  %v4176_v29 = vld [vmem:[#allocation10 + $0x110] ss:$12 sps:$4 sm:$0xff]   ;;  %v4173_v30 = vld [vmem:[#allocation10 + $0x108] ss:$12 sps:$4 sm:$0xff]  }
 0x190   : > { %1263 = vmatprep.subr.bf16.mxu0 %v4088_v44  ;;  %3698 = vmatpush3.bf16.msra.mxu1 %v4114_v7  ;;  %v4128_v44 = vld [vmem:[#allocation5 + $0x210] ss:$12 sps:$4 sm:$0xff]  }
 0x191   : > { %3699 = vmatprep.subr.bf16.mxu1 %v4120_v15  ;;  %v713_v39 = vsel %vm617_vm0, %v708_v36, %v712_v34  ;;  %v4149_v7 = vld [vmem:[#allocation10 + $0x78] ss:$12 sps:$4 sm:$0xff]   ;;  %v4178_v36 = vld [vmem:[#allocation10 + $0x120] ss:$12 sps:$4 sm:$0xff]  }
 0x192   : > { %1498 = vmatmul.mubr.bf16.gmra.mrb[12].mxu1 %v5207_v8  ;;  %v4180_v34 = vld [vmem:[#allocation10 + $0x124] ss:$12 sps:$4 sm:$0xff]  }
 0x193   : > { %1264 = vmatpush1.bf16.msra.mxu0 %v4090_v49  ;;  %1505 = vmatprep.mubr.bf16.mxu1 %v5247_v55  ;;  %v732_v49 = vrot.slane %v5207_v8, 1 }
 0x194   : > { %1265 = vmatprep.subr.bf16.mxu0 %v4091_v51  ;;  %3700 = vmatpush3.bf16.msra.mxu1 %v4120_v15  ;;  %v735_v51 = vrot.slane %v5221_v22, 1  ;;  %v4160_v15 = vld [vmem:[#allocation10 + $0xc4] ss:$12 sps:$4 sm:$0xff]  }
 0x195   : > { %v734_v58 = vsel %vm722_vm1, %v732_v49, %v733_v50  ;;  %v4196_v49 = vld [vmem:[#allocation10 + $0x170] ss:$12 sps:$4 sm:$0xff]  }
 0x197   : > { %1266 = vmatpush1.bf16.msra.mxu0 %v4093_v52 }
 0x198   : > { %1340 = vmatprep.subr.bf16.mxu0 %v4098_v60  ;;  %v4139_v60 = vld [vmem:[#allocation10 + $0x1c] ss:$12 sps:$4 sm:$0xff]  }
 0x19a   : > { %1268 = vmatmul.mubr.bf16.vlgmr.msra.gmra.mrb[0].mxu0 %v5170_v31  ;;  %1506 = vmatmul.mubr.bf16.gmra.mrb[16].mxu1 %v5221_v22 }
 0x19b   : > { %1341 = vmatpush1.bf16.msra.mxu0 %v4096_v3  ;;  %1275 = vmatprep.mubr.bf16.mxu0 %v5195_v61  ;;  %v4121_v61 = vld [vmem:[#allocation5 + $0x230] ss:$12 sps:$4 sm:$0xff]   ;;  %v4148_v3 = vld [vmem:[#allocation10 + $0x64] ss:$12 sps:$4 sm:$0xff]  }
 0x19c   : > { %1342 = vmatprep.subr.bf16.mxu0 %v4105_v5  ;;  %1513 = vmatprep.mubr.bf16.mxu1 %v5258_v9  ;;  %v4146_v5 = vld [vmem:[#allocation10 + $0x60] ss:$12 sps:$4 sm:$0xff]  }
 0x19d   : > { %3701 = vmatprep.subr.bf16.mxu1 %v4121_v61 }
 0x19e   : > { %3702 = vmatpush3.bf16.msra.mxu1 %v4121_v61  ;;  %v4171_v61 = vld [vmem:[#allocation10 + $0xf8] ss:$12 sps:$4 sm:$0xff]  }
 0x19f   : > { %1343 = vmatpush1.bf16.msra.mxu0 %v4103_v6  ;;  %v4151_v6 = vld [vmem:[#allocation10 + $0x7c] ss:$12 sps:$4 sm:$0xff]  }
 0x1a0   : > { %1344 = vmatprep.subr.bf16.mxu0 %v4112_v16  ;;  %v4161_v16 = vld [vmem:[#allocation10 + $0xc8] ss:$12 sps:$4 sm:$0xff]  }
 0x1a2   : > { %1276 = vmatmul.mubr.bf16.gmra.mrb[4].mxu0 %v5179_v41  ;;  %1514 = vmatmul.mubr.bf16.gmra.mrb[20].mxu1 %v5235_v42  ;;  %v4127_v41 = vld [vmem:[#allocation5 + $0x1fc] ss:$12 sps:$4 sm:$0xff]  }
 0x1a3   : > { %1285 = vmatprep.mubr.bf16.mxu0 %v5218_v19  ;;  %1345 = vmatpush1.bf16.msra.mxu0 %v4110_v17  ;;  %v723_v19 = vrot.slane %v5170_v31, 1  ;;  %v729_v31 = vrot.slane %v5189_v57, 1  ;;  %v4162_v17 = vld [vmem:[#allocation10 + $0x8] ss:$12 sps:$4 sm:$0xff]  }
 0x1a4   : > { %1346 = vmatprep.subr.bf16.mxu0 %v4119_v24  ;;  %1521 = vmatprep.mubr.bf16.mxu1 %v701_v28  ;;  %v4170_v24 = vld [vmem:[#allocation10 + $0xf4] ss:$12 sps:$4 sm:$0xff]  }
 0x1a5   : > { %v725_v48 = vsel %vm722_vm1, %v723_v19, %v724_v43  ;;  %v4187_v19 = vld [vmem:[#allocation10 + $0x80] ss:$12 sps:$4 sm:$0xff]  }
 0x1a6   : > { %v4190_v43 = vld [vmem:[#allocation10 + $0x154] ss:$12 sps:$4 sm:$0xff]  }
 0x1a7   : > { %1347 = vmatpush1.bf16.msra.mxu0 %v4117_v27  ;;  %v4172_v27 = vld [vmem:[#allocation10 + $0x38] ss:$12 sps:$4 sm:$0xff]  }
 0x1a8   : > { %1348 = vmatprep.subr.bf16.mxu0 %v4124_v33  ;;  %v4177_v33 = vld [vmem:[#allocation10 + $0x50] ss:$12 sps:$4 sm:$0xff]  }
 0x1aa   : > { %1286 = vmatmul.mubr.bf16.gmra.mrb[8].mxu0 %v5189_v57  ;;  %1522 = vmatmul.mubr.bf16.gmra.mrb[24].mxu1 %v5244_v54  ;;  %v736_v57 = vrot.slane %v5224_v26, 1 }
 0x1ab   : > { %1295 = vmatprep.mubr.bf16.mxu0 %v5231_v37  ;;  %1349 = vmatpush1.bf16.msra.mxu0 %v4122_v35  ;;  %v731_v37 = vsel %vm722_vm1, %v729_v31, %v730_v32  ;;  %v4181_v35 = vld [vmem:[#allocation10 + $0x128] ss:$12 sps:$4 sm:$0xff]  }
 0x1ac   : > { %1350 = vmatprep.subr.bf16.mxu0 %v4127_v41  ;;  %1529 = vmatprep.mubr.bf16.mxu1 %v713_v39  ;;  %v737_v52 = vsel %vm722_vm1, %v735_v51, %v736_v57  ;;  %v4182_v41 = vld [vmem:[#allocation10 + $0x68] ss:$12 sps:$4 sm:$0xff]   ;;  %v4197_v57 = vld [vmem:[#allocation10 + $0xb0] ss:$12 sps:$4 sm:$0xff]  }
 0x1ad   : > { %v4193_v51 = vld [vmem:[#allocation10 + $0x168] ss:$12 sps:$4 sm:$0xff]  }
 0x1af   : > { %1351 = vmatpush1.bf16.msra.mxu0 %v4125_v38  ;;  %v4185_v38 = vld [vmem:[#allocation10 + $0x13c] ss:$12 sps:$4 sm:$0xff]  }
 0x1b0   : > { %1352 = vmatprep.subr.bf16.mxu0 %v4130_v40  ;;  %v4183_v40 = vld [vmem:[#allocation10 + $0x138] ss:$12 sps:$4 sm:$0xff]  }
 0x1b2   : > { %1296 = vmatmul.mubr.bf16.gmra.mrb[12].mxu0 %v5207_v8  ;;  %1530 = vmatmul.mubr.bf16.gmra.mrb[28].mxu1 %v5263_v14  ;;  %v738_v8 = vrot.slane %v5235_v42, 1 }
 0x1b3   : > { %1305 = vmatprep.mubr.bf16.mxu0 %v5247_v55  ;;  %1353 = vmatpush1.bf16.msra.mxu0 %v4128_v44  ;;  %v4191_v44 = vld [vmem:[#allocation10 + $0x158] ss:$12 sps:$4 sm:$0xff]  }
 0x1b4   : > { %1354 = vmatprep.subr.bf16.mxu0 %v4133_v45  ;;  %3703 = vmatprep.mubr.bf16.mxu1 %v725_v48  ;;  %v740_v55 = vsel %vm722_vm1, %v738_v8, %v739_v10  ;;  %v4188_v45 = vld [vmem:[#allocation10 + $0x150] ss:$12 sps:$4 sm:$0xff]  }
 0x1b7   : > { %1355 = vmatpush1.bf16.msra.mxu0 %v4131_v46  ;;  %v4192_v46 = vld [vmem:[#allocation10 + $0x98] ss:$12 sps:$4 sm:$0xff]  }
 0x1b8   : > { %3609 = vmatprep.subr.bf16.mxu0 %v4161_v16 }
 0x1ba   : > { %1306 = vmatmul.mubr.bf16.gmra.mrb[16].mxu0 %v5221_v22  ;;  %3704 = vmatmul.mubr.bf16.vlgmr.msra.gmra.mrb[32].mxu1 %v5204_v4  ;;  %v742_v22 = vrot.slane %v5253_v63, 1  ;;  %v4142_v63 = vld [vmem:[#allocation10 + $0x34] ss:$12 sps:$4 sm:$0xff]  }
 0x1bb   : > { %1315 = vmatprep.mubr.bf16.mxu0 %v5258_v9  ;;  %3707 = vmatprep.mubr.bf16.mxu1 %v731_v37  ;;  %v4152_v9 = vld [vmem:[#allocation10 + $0x90] ss:$12 sps:$4 sm:$0xff]  }
 0x1bc   : > { %v743_v26 = vsel %vm722_vm1, %v741_v53, %v742_v22  ;;  %v4200_v53 = vld [vmem:[#allocation10 + $0x184] ss:$12 sps:$4 sm:$0xff]  }
 0x1c2   : > { %1316 = vmatmul.mubr.bf16.gmra.mrb[20].mxu0 %v5235_v42  ;;  %3708 = vmatmul.mubr.bf16.gmra.mrb[36].mxu1 %v734_v58  ;;  %v746_v42 = vsel %vm722_vm1, %v744_v56, %v745_v59 }
 0x1c3   : > { %1325 = vmatprep.mubr.bf16.mxu0 %v701_v28  ;;  %3711 = vmatprep.mubr.bf16.mxu1 %v737_v52  ;;  %v4175_v28 = vld [vmem:[#allocation10 + $0x10c] ss:$12 sps:$4 sm:$0xff]  }
 0x1ca   : > { %1326 = vmatmul.mubr.bf16.gmra.mrb[24].mxu0 %v5244_v54  ;;  %3712 = vmatmul.mubr.bf16.gmra.mrb[40].mxu1 %v740_v55  ;;  %v4136_v54 = vld [vmem:[#allocation10 + $0x4] ss:$12 sps:$4 sm:$0xff]  }
 0x1cb   : > { %1333 = vmatprep.mubr.bf16.mxu0 %v713_v39  ;;  %3715 = vmatprep.mubr.bf16.mxu1 %v743_v26  ;;  %v4186_v39 = vld [vmem:[#allocation10 + $0x140] ss:$12 sps:$4 sm:$0xff]  }
 0x1cc   : > { %2384 = vmatprep.subr.bf16.mxu1 %v4136_v54  ;;  %v5321_v54 = vld [vmem:[#allocation10 + $0x188] ss:$12 sps:$4 sm:$0xff]  }
 0x1d2   : > { %1334 = vmatmul.mubr.bf16.gmra.mrb[28].mxu0 %v5263_v14  ;;  %3716 = vmatmul.mubr.bf16.gmra.mrb[44].mxu1 %v746_v42  ;;  %v4158_v14 = vld [vmem:[#allocation10 + $0xc0] ss:$12 sps:$4 sm:$0xff]  }
 0x1d3   : > { %1372 = vmatprep.mubr.bf16.mxu0 %v4690_v47 }
 0x1da   : > { %1373 = vmatmul.mubr.bf16.vlgmr.msra.gmra.mrb[0].mxu0 %v725_v48 }
 0x1db   : > { %1380 = vmatprep.mubr.bf16.mxu0 %v4690_v47  ;;  %3610 = vmatpush3.bf16.msra.mxu0 %v4162_v17 }
 0x1dc   : > { %3611 = vmatprep.subr.bf16.mxu0 %v4166_v20 }
 0x1df   : > { %3612 = vmatpush3.bf16.msra.mxu0 %v4167_v23 }
 0x1e0   : > { %3613 = vmatprep.subr.bf16.mxu0 %v4171_v61 }
 0x1e2   : > { %1381 = vmatmul.mubr.bf16.gmra.mrb[4].mxu0 %v5204_v4  ;;  %v4134_v4 = vld [vmem:[#allocation10] ss:$12 sps:$4 sm:$0xff]  }
 0x1e3   : > { %1390 = vmatprep.mubr.bf16.mxu0 %v4690_v47  ;;  %2385 = vmatpush1.bf16.msra.mxu1 %v4134_v4 }
 0x1e4   : > { %2386 = vmatprep.subr.bf16.mxu1 %v4139_v60  ;;  %3614 = vmatpush3.bf16.msra.mxu0 %v4172_v27 }
 0x1e5   : > { %3615 = vmatprep.subr.bf16.mxu0 %v4176_v29 }
 0x1e7   : > { %2387 = vmatpush1.bf16.msra.mxu1 %v4137_v62 }
 0x1e8   : > { %2388 = vmatprep.subr.bf16.mxu1 %v4142_v63  ;;  %3616 = vmatpush3.bf16.msra.mxu0 %v4177_v33 }
 0x1e9   : > { %3617 = vmatprep.subr.bf16.mxu0 %v4181_v35 }
 0x1ea   : > { %1391 = vmatmul.mubr.bf16.gmra.mrb[8].mxu0 %v731_v37  ;;  %v4195_v37 = vld [vmem:[#allocation10 + $0x16c] ss:$12 sps:$4 sm:$0xff]  }
 0x1eb   : > { %1400 = vmatprep.mubr.bf16.mxu0 %v4690_v47  ;;  %2389 = vmatpush1.bf16.msra.mxu1 %v4140_v0 }
 0x1ec   : > { %2390 = vmatprep.subr.bf16.mxu1 %v4145_v1  ;;  %3618 = vmatpush3.bf16.msra.mxu0 %v4182_v41 }
 0x1ed   : > { %3619 = vmatprep.subr.bf16.mxu0 %v4186_v39 }
 0x1ef   : > { %2391 = vmatpush1.bf16.msra.mxu1 %v4143_v2 }
 0x1f0   : > { %2392 = vmatprep.subr.bf16.mxu1 %v4148_v3  ;;  %3620 = vmatpush3.bf16.msra.mxu0 %v4187_v19 }
 0x1f1   : > { %3621 = vmatprep.subr.bf16.mxu0 %v4191_v44 }
 0x1f2   : > { %1401 = vmatmul.mubr.bf16.gmra.mrb[12].mxu0 %v734_v58 }
 0x1f3   : > { %1410 = vmatprep.mubr.bf16.mxu0 %v4690_v47  ;;  %2393 = vmatpush1.bf16.msra.mxu1 %v4146_v5 }
 0x1f4   : > { %2394 = vmatprep.subr.bf16.mxu1 %v4151_v6  ;;  %3622 = vmatpush3.bf16.msra.mxu0 %v4192_v46 }
 0x1f5   : > { %3623 = vmatprep.subr.bf16.mxu0 %v4196_v49 }
 0x1f7   : > { %2395 = vmatpush1.bf16.msra.mxu1 %v4149_v7 }
 0x1f8   : > { %2396 = vmatprep.subr.bf16.mxu1 %v4154_v11  ;;  %3624 = vmatpush3.bf16.msra.mxu0 %v4197_v57 }
 0x1f9   : > { %3719 = vmatprep.subr.bf16.mxu0 %v5321_v54 }
 0x1fa   : > { %1411 = vmatmul.mubr.bf16.gmra.mrb[16].mxu0 %v737_v52 }
 0x1fb   : > { %1420 = vmatprep.mubr.bf16.mxu0 %v4690_v47  ;;  %2397 = vmatpush1.bf16.msra.mxu1 %v4152_v9 }
 0x1fc   : > { %2398 = vmatprep.subr.bf16.mxu1 %v4157_v13 }
 0x1ff   : > { %2399 = vmatpush1.bf16.msra.mxu1 %v4155_v12 }
 0x200   : > { %2400 = vmatprep.subr.bf16.mxu1 %v4160_v15 }
 0x202   : > { %1421 = vmatmul.mubr.bf16.gmra.mrb[20].mxu0 %v740_v55 }
 0x203   : > { %1430 = vmatprep.mubr.bf16.mxu0 %v4690_v47  ;;  %2401 = vmatpush1.bf16.msra.mxu1 %v4158_v14 }
 0x204   : > { %2402 = vmatprep.subr.bf16.mxu1 %v4165_v18 }
 0x207   : > { %2403 = vmatpush1.bf16.msra.mxu1 %v4163_v21 }
 0x208   : > { %2404 = vmatprep.subr.bf16.mxu1 %v4170_v24 }
 0x20a   : > { %1431 = vmatmul.mubr.bf16.gmra.mrb[24].mxu0 %v743_v26 }
 0x20b   : > { %1438 = vmatprep.mubr.bf16.mxu0 %v4690_v47  ;;  %2405 = vmatpush1.bf16.msra.mxu1 %v4168_v25 }
 0x20c   : > { %2406 = vmatprep.subr.bf16.mxu1 %v4175_v28 }
 0x20f   : > { %2407 = vmatpush1.bf16.msra.mxu1 %v4173_v30 }
 0x210   : > { %2408 = vmatprep.subr.bf16.mxu1 %v4180_v34 }
 0x212   : > { %1439 = vmatmul.mubr.bf16.gmra.mrb[32].mxu0 %v746_v42 }
 0x213   : > { %2409 = vmatpush1.bf16.msra.mxu1 %v4178_v36 }
 0x214   : > { %2410 = vmatprep.subr.bf16.mxu1 %v4185_v38 }
 0x217   : > { %2411 = vmatpush1.bf16.msra.mxu1 %v4183_v40 }
 0x218   : > { %2412 = vmatprep.subr.bf16.mxu1 %v4190_v43 }
 0x21b   : > { %2413 = vmatpush1.bf16.msra.mxu1 %v4188_v45 }
 0x21c   : > { %2414 = vmatprep.subr.bf16.mxu1 %v4195_v37 }
 0x21f   : > { %2415 = vmatpush1.bf16.msra.mxu1 %v4193_v51 }
 0x220   : > { %2469 = vmatprep.subr.bf16.mxu1 %v4200_v53 }
 0x24d   : > { %v3545_v48 = vpop.f32.mrb[0].mxu1 }
 0x24e   : > { %v3546_v31 = vpop.f32.mrb[1].mxu1 }
 0x24f   : > { %v3548_v32 = vpop.f32.mrb[2].mxu1 }
 0x250   : > { %v3549_v50 = vpop.f32.mrb[3].mxu1 }
 0x255   : > { %v3551_v58 = vpop.f32.mrb[4].mxu1 }
 0x256   : > { %v3552_v52 = vpop.f32.mrb[5].mxu1 }
 0x257   : > { %v3554_v8 = vpop.f32.mrb[6].mxu1 }
 0x258   : > { %v3555_v10 = vpop.f32.mrb[7].mxu1 }
 0x25d   : > { %v3557_v22 = vpop.f32.mrb[8].mxu1 }
 0x25e   : > { %v3558_v55 = vpop.f32.mrb[9].mxu1 }
 0x25f   : > { %v3559_v26 = vadd.f32 %v3558_v55, %v3557_v22  ;;  %v3560_v56 = vpop.f32.mrb[10].mxu1 }
 0x260   : > { %v3561_v59 = vpop.f32.mrb[11].mxu1 }
 0x261   : > { %v3562_v42 = vadd.f32 %v3561_v59, %v3560_v56 }
 0x265   : > { %v3563_v4 = vpop.f32.mrb[12].mxu1 }
 0x266   : > { %v3564_v60 = vpop.f32.mrb[13].mxu1 }
 0x267   : > { %v3565_v62 = vadd.f32 %v3564_v60, %v3563_v4  ;;  %v3566_v63 = vpop.f32.mrb[14].mxu1 }
 0x268   : > { %v3567_v0 = vpop.f32.mrb[15].mxu1 }
 0x269   : > { %v3568_v1 = vadd.f32 %v3567_v0, %v3566_v63 }
 0x26d   : > { %v3569_v2 = vpop.f32.mrb[16].mxu1 }
 0x26e   : > { %v3570_v3 = vpop.f32.mrb[17].mxu1 }
 0x26f   : > { %v3571_v5 = vadd.f32 %v3570_v3, %v3569_v2  ;;  %v3572_v6 = vpop.f32.mrb[18].mxu1 }
 0x270   : > { %v3573_v7 = vpop.f32.mrb[19].mxu1 }
 0x271   : > { %v3574_v9 = vadd.f32 %v3573_v7, %v3572_v6 }
 0x275   : > { %v3575_v11 = vpop.f32.mrb[20].mxu1 }
 0x276   : > { %v3576_v12 = vpop.f32.mrb[21].mxu1 }
 0x277   : > { %v3577_v13 = vadd.f32 %v3576_v12, %v3575_v11  ;;  %v3578_v14 = vpop.f32.mrb[22].mxu1  ;;  %v5343_v11 = vld [vmem:[#allocation8] ss:$0 sm:$0xff] }
 0x278   : > { %v3579_v15 = vpop.f32.mrb[23].mxu1 }
 0x279   : > { %v3580_v16 = vadd.f32 %v3579_v15, %v3578_v14 }
 0x27d   : > { %v3581_v17 = vpop.f32.mrb[24].mxu1 }
 0x27e   : > { %v3582_v18 = vpop.f32.mrb[25].mxu1 }
 0x27f   : > { %v3583_v20 = vadd.f32 %v3582_v18, %v3581_v17  ;;  %v3584_v21 = vpop.f32.mrb[26].mxu1 }
 0x280   : > { %v3585_v23 = vpop.f32.mrb[27].mxu1 }
 0x281   : > { %v3586_v24 = vadd.f32 %v3585_v23, %v3584_v21 }
 0x285   : > { %v3587_v61 = vpop.f32.mrb[28].mxu1 }
 0x286   : > { %v3588_v25 = vpop.f32.mrb[29].mxu1 }
 0x287   : > { %v3589_v27 = vadd.f32 %v3588_v25, %v3587_v61  ;;  %v3590_v28 = vpop.f32.mrb[30].mxu1 }
 0x288   : > { %v3591_v29 = vpop.f32.mrb[31].mxu1 }
 0x289   : > { %v3592_v30 = vadd.f32 %v3591_v29, %v3590_v28 }
 0x28d   : > { %v3705_v33 = vpop.f32.mrb[32].mxu1 }
 0x28e   : > { %v1572_v34 = vpop.f32.mrb[33].mxu1 }
 0x28f   : > { %v3706_v35 = vpop.f32.mrb[34].mxu1 }
 0x290   : > { %v1574_v36 = vpop.f32.mrb[35].mxu1 }
 0x295   : > { %v3709_v41 = vpop.f32.mrb[36].mxu1 }
 0x296   : > { %v1593_v38 = vadd.f32 %v3709_v41, %v3565_v62  ;;  %v1584_v39 = vpop.f32.mrb[37].mxu1 }
 0x297   : > { %v1585_v40 = vadd.f32 %v3559_v26, %v1584_v39  ;;  %v3710_v19 = vpop.f32.mrb[38].mxu1 }
 0x298   : > { %v1596_v43 = vadd.f32 %v3710_v19, %v3568_v1  ;;  %v1587_v44 = vpop.f32.mrb[39].mxu1 }
 0x299   : > { %v1588_v45 = vadd.f32 %v3562_v42, %v1587_v44 }
 0x29d   : > { %v3713_v46 = vpop.f32.mrb[40].mxu1 }
 0x29e   : > { %v5324_v48 = vadd.f32 %v3713_v46, %v3577_v13  ;;  %v1600_v31 = vpop.f32.mrb[41].mxu1 }
 0x29f   : > { %v5326_v32 = vadd.f32 %v3571_v5, %v1600_v31  ;;  %v3714_v37 = vpop.f32.mrb[42].mxu1  ;;  %v5341_v5 = vld [vmem:[#allocation7] ss:$0 sm:$0xff] }
 0x2a0   : > { %v5328_v49 = vadd.f32 %v3714_v37, %v3580_v16  ;;  %v1603_v50 = vpop.f32.mrb[43].mxu1 }
 0x2a1   : > { %v5330_v51 = vadd.f32 %v3574_v9, %v1603_v50 }
 0x2a5   : > { %v1335_v57 = vpop.f32.mrb[28].mxu0  ;;  %v3717_v52 = vpop.f32.mrb[44].mxu1 }
 0x2a6   : > { %v1336_v58 = vpop.f32.mrb[29].mxu0  ;;  %v5332_v10 = vadd.f32 %v3717_v52, %v3589_v27  ;;  %v1616_v53 = vpop.f32.mrb[45].mxu1 }
 0x2a7   : > { %v1337_v8 = vpop.f32.mrb[30].mxu0  ;;  %v5334_v55 = vadd.f32 %v3583_v20, %v1616_v53  ;;  %v3718_v26 = vpop.f32.mrb[46].mxu1  ;;  %v1713_v20 = vstv %s1712_s16  ;;  %s5686_s16 = sld [smem:[#allocation40_spill]] }
 0x2a8   : > { %v1338_v22 = vpop.f32.mrb[31].mxu0  ;;  %v5336_v56 = vadd.f32 %v3718_v26, %v3592_v30  ;;  %v1619_v59 = vpop.f32.mrb[47].mxu1  ;;  %vm1714_vm2 = vcmp.eq.s32.totalorder %v1713_v20, 1 }
 0x2a9   : > { %v5338_v42 = vadd.f32 %v3586_v24, %v1619_v59 }
 0x2ad   : > { %v1374_v4 = vpop.f32.mrb[0].mxu0 }
 0x2ae   : > { %v1376_v60 = vpop.f32.mrb[1].mxu0 }
 0x2af   : > { %v1377_v62 = vpop.f32.mrb[2].mxu0 }
 0x2b0   : > { %v1379_v63 = vpop.f32.mrb[3].mxu0 }
 0x2b5   : > { %v1382_v0 = vpop.f32.mrb[4].mxu0 }
 0x2b6   : > { %v1384_v1 = vpop.f32.mrb[5].mxu0 }
 0x2b7   : > { %v1631_v2 = vadd.f32 %v1384_v1, %v1374_v4  ;;  %v1386_v3 = vpop.f32.mrb[6].mxu0 }
 0x2b8   : > { %v1388_v6 = vpop.f32.mrb[7].mxu0 }
 0x2b9   : > { %v1643_v7 = vadd.f32 %v1631_v2, %v1585_v40  ;;  %v1632_v9 = vadd.f32 %v1388_v6, %v1377_v62 }
 0x2bb   : > { %v1662_v12 = vmul.f32 %v5341_v5, %v1643_v7  ;;  %v1644_v13 = vadd.f32 %v1632_v9, %v1588_v45 }
 0x2bd   : > { %v1681_v14 = vadd.f32 %v5343_v11, %v1662_v12  ;;  %v1663_v15 = vmul.f32 %v5341_v5, %v1644_v13  ;;  %v1392_v16 = vpop.f32.mrb[8].mxu0 }
 0x2be   : > { %v1394_v17 = vpop.f32.mrb[9].mxu0 }
 0x2bf   : > { %v1682_v18 = vadd.f32 %v5343_v11, %v1663_v15  ;;  %v1633_v21 = vadd.f32 %v1394_v17, %v1382_v0  ;;  %v1396_v23 = vpop.f32.mrb[10].mxu0  ;;  %v1693_v61 = vmax.f32 %v1681_v14, 0.0 }
 0x2c0   : > { %v1398_v24 = vpop.f32.mrb[11].mxu0 }
 0x2c1   : > { %v1694_v25 = vmax.f32 %v1682_v18, 0.0  ;;  %v1645_v27 = vadd.f32 %v1633_v21, %v1593_v38  ;;  %v1634_v28 = vadd.f32 %v1398_v24, %v1386_v3 }
 0x2c3   : > { %v1705_v29 = vpack.c.bf16 %v1694_v25, %v1693_v61  ;;  %v1664_v30 = vmul.f32 %v5341_v5, %v1645_v27  ;;  %v1646_v33 = vadd.f32 %v1634_v28, %v1596_v43  ;;  %v4198_v25 = vld [vmem:[#allocation10 + $0x180] ss:$12 sps:$4 sm:$0xff]  }
 0x2c5   : > { %v1715_v34 = vsel %vm1714_vm2, %v1705_v29, 0  ;;  %v1683_v35 = vadd.f32 %v5343_v11, %v1664_v30  ;;  %v1665_v36 = vmul.f32 %v5341_v5, %v1646_v33  ;;  %v1402_v41 = vpop.f32.mrb[12].mxu0  ;;  %v4211_v30 = vld [vmem:[#allocation10 + $0x1a0] ss:$12 sps:$4 sm:$0xff]  }
 0x2c6   : > { %v1404_v39 = vpop.f32.mrb[13].mxu0  ;;  %v1722_v40 = vshrl.u32 %v1715_v34, 16  ;;  %v1725_v45 = vshll.u32 %v1715_v34, 16 }
 0x2c7   : > { %v1684_v19 = vadd.f32 %v5343_v11, %v1665_v36  ;;  %v1635_v44 = vadd.f32 %v1404_v39, %v1392_v16  ;;  %v1406_v38 = vpop.f32.mrb[14].mxu0  ;;  %v1695_v43 = vmax.f32 %v1683_v35, 0.0  ;;  %v4201_v39 = vld [vmem:[#allocation10 + $0x198] ss:$12 sps:$4 sm:$0xff]  }
 0x2c8   : > { %v1408_v46 = vpop.f32.mrb[15].mxu0  ;;  %v1724_v31 = vrot.slane %v1722_v40, 7 }
 0x2c9   : > { %v1696_v50 = vmax.f32 %v1684_v19, 0.0  ;;  %v1647_v57 = vadd.f32 %v1635_v44, %v5326_v32  ;;  %v1636_v58 = vadd.f32 %v1408_v46, %v1396_v23  ;;  %v4215_v46 = vld [vmem:[#allocation10 + $0x1b8] ss:$12 sps:$4 sm:$0xff]  }
 0x2ca   : > { %v1727_v52 = vor.u32 %v1725_v45, %v1724_v31  ;;  %v5362_v26 = vsel %vm5353_vm5, %v1724_v31, 0  ;;  %v4206_v45 = vld [vmem:[#allocation10 + $0x1b4] ss:$12 sps:$4 sm:$0xff]  }
 0x2cb   : > { %v1706_v8 = vpack.c.bf16 %v1696_v50, %v1695_v43  ;;  %v1666_v53 = vmul.f32 %v5341_v5, %v1647_v57  ;;  %v1648_v22 = vadd.f32 %v1636_v58, %v5330_v51  ;;  %v1798_v0 = vshll.u32 %v5362_v26, 16 }
 0x2cc   : > { %v5366_v59 = vsel %vm5353_vm5, 0, %v1727_v52  ;;  %v1881_v37 = vrot.slane %v5362_v26, 1 }
 0x2cd   : > { %v1685_v4 = vadd.f32 %v5343_v11, %v1666_v53  ;;  %v1667_v60 = vmul.f32 %v5341_v5, %v1648_v22  ;;  %v1412_v32 = vpop.f32.mrb[16].mxu0  ;;  %v1793_v63 = vshll.u32 %v5366_v59, 16  ;;  %v1729_v1 = vshrl.u32 %v1706_v8, 16 }
 0x2ce   : > { %v1414_v62 = vpop.f32.mrb[17].mxu0  ;;  %v1732_v6 = vshll.u32 %v1706_v8, 16  ;;  %v1791_v9 = vshrl.u32 %v5366_v59, 16  ;;  %v1800_v20 = vrot.slane %v1798_v0, 1  ;;  %v4204_v0 = vld [vmem:[#allocation10 + $0x1b0] ss:$12 sps:$4 sm:$0xff]  }
 0x2cf   : > { %v1686_v51 = vadd.f32 %v5343_v11, %v1667_v60  ;;  %v1637_v2 = vadd.f32 %v1414_v62, %v1402_v41  ;;  %v1416_v3 = vpop.f32.mrb[18].mxu0  ;;  %v1795_v12 = vrot.slane %v1793_v63, 1  ;;  %v1731_v13 = vrot.slane %v1729_v1, 7 }
 0x2d0   : > { %v1418_v7 = vpop.f32.mrb[19].mxu0  ;;  %v1697_v14 = vmax.f32 %v1685_v4, 0.0 }
 0x2d1   : > { %v1698_v15 = vmax.f32 %v1686_v51, 0.0  ;;  %v1649_v16 = vadd.f32 %v1637_v2, %v5324_v48  ;;  %v1638_v17 = vadd.f32 %v1418_v7, %v1406_v38  ;;  %v1796_v18 = vor.u32 %v1795_v12, %v1791_v9  ;;  %v4203_v48 = vld [vmem:[#allocation10 + $0x19c] ss:$12 sps:$4 sm:$0xff]   ;;  %v4210_v2 = vld [vmem:[#allocation10 + $0x1cc] ss:$12 sps:$4 sm:$0xff]  }
 0x2d2   : > { %v1734_v21 = vor.u32 %v1732_v6, %v1731_v13  ;;  %v5379_v27 = vsel %vm5353_vm5, %v1731_v13, 0 }
 0x2d3   : > { %v1707_v23 = vpack.c.bf16 %v1698_v15, %v1697_v14  ;;  %v1668_v24 = vmul.f32 %v5341_v5, %v1649_v16  ;;  %v1650_v61 = vadd.f32 %v1638_v17, %v5328_v49  ;;  %v1801_v28 = vsel %vm617_vm0, %v1796_v18, %v1800_v20  ;;  %v4208_v14 = vld [vmem:[#allocation10 + $0x1c8] ss:$12 sps:$4 sm:$0xff]   ;;  %v4214_v20 = vld [vmem:[#allocation10 + $0x1e4] ss:$12 sps:$4 sm:$0xff]  }
 0x2d4   : > { %v5384_v29 = vsel %vm5353_vm5, 0, %v1734_v21  ;;  %2416 = vmatprep.mubr.bf16.mxu1 %v1801_v28  ;;  %2586 = vmatprep.mubr.bf16.mxu0 %v1801_v28  ;;  %v1810_v41 = vshll.u32 %v5379_v27, 16  ;;  %v4220_v21 = vld [vmem:[#allocation10 + $0x1e8] ss:$12 sps:$4 sm:$0xff]  }
 0x2d5   : > { %v1687_v33 = vadd.f32 %v5343_v11, %v1668_v24  ;;  %v1669_v34 = vmul.f32 %v5341_v5, %v1650_v61  ;;  %v1422_v49 = vpop.f32.mrb[20].mxu0  ;;  %2417 = vmatmul.mubr.bf16.vlgmr.msra.gmra.mrb[48].mxu1 %v5366_v59  ;;  %2587 = vmatmul.mubr.bf16.vlgmr.msra.gmra.mrb[36].mxu0 %v5366_v59  ;;  %v1805_v36 = vshll.u32 %v5384_v29, 16  ;;  %v1736_v40 = vshrl.u32 %v1707_v23, 16 }
 0x2d6   : > { %v1424_v35 = vpop.f32.mrb[21].mxu0  ;;  %2470 = vmatpush1.bf16.msra.mxu1 %v4198_v25  ;;  %3720 = vmatpush3.bf16.msra.mxu0 %v5321_v54  ;;  %v1739_v31 = vshll.u32 %v1707_v23, 16  ;;  %v1803_v50 = vshrl.u32 %v5384_v29, 16  ;;  %v1812_v60 = vrot.slane %v1810_v41, 1 }
 0x2d7   : > { %v1688_v19 = vadd.f32 %v5343_v11, %v1669_v34  ;;  %v1639_v44 = vadd.f32 %v1424_v35, %v1412_v32  ;;  %v1426_v38 = vpop.f32.mrb[22].mxu0  ;;  %v1807_v57 = vrot.slane %v1805_v36, 1  ;;  %2471 = vmatprep.subr.bf16.mxu1 %v4203_v48  ;;  %v1738_v58 = vrot.slane %v1736_v40, 7  ;;  %3721 = vmatprep.subr.bf16.mxu0 %v4211_v30 }
 0x2d8   : > { %v1428_v43 = vpop.f32.mrb[23].mxu0  ;;  %v1699_v52 = vmax.f32 %v1687_v33, 0.0 }
 0x2d9   : > { %v1700_v8 = vmax.f32 %v1688_v19, 0.0  ;;  %v1651_v53 = vadd.f32 %v1639_v44, %v5334_v55  ;;  %v1640_v22 = vadd.f32 %v1428_v43, %v1416_v3  ;;  %v1808_v4 = vor.u32 %v1807_v57, %v1803_v50  ;;  %v4216_v3 = vld [vmem:[#allocation10 + $0x1d0] ss:$12 sps:$4 sm:$0xff]   ;;  %v4212_v44 = vld [vmem:[#allocation10 + $0x1e0] ss:$12 sps:$4 sm:$0xff]  }
 0x2da   : > { %v1741_v32 = vor.u32 %v1739_v31, %v1738_v58  ;;  %2472 = vmatpush1.bf16.msra.mxu1 %v4201_v39  ;;  %v5400_v1 = vsel %vm5353_vm5, %v1738_v58, 0  ;;  %3722 = vmatpush3.bf16.msra.mxu0 %v4211_v30  ;;  %v1718_v50 = vstv %s5419_s30  ;;  %s5687_s30 = smov %s5686_s16 }
 0x2db   : > { %v1708_v62 = vpack.c.bf16 %v1700_v8, %v1699_v52  ;;  %v1670_v54 = vmul.f32 %v5341_v5, %v1651_v53  ;;  %v1652_v63 = vadd.f32 %v1640_v22, %v5338_v42  ;;  %v1813_v51 = vsel %vm617_vm0, %v1808_v4, %v1812_v60  ;;  %2473 = vmatprep.subr.bf16.mxu1 %v4206_v45  ;;  %v4219_v45 = vld [vmem:[#allocation10 + $0x1fc] ss:$12 sps:$4 sm:$0xff]   ;;  %v4217_v8 = vld [vmem:[#allocation10 + $0x1f8] ss:$12 sps:$4 sm:$0xff]  }
 0x2dc   : > { %v5405_v55 = vsel %vm5353_vm5, 0, %v1741_v32  ;;  %3723 = vmatprep.subr.bf16.mxu0 %v4215_v46  ;;  %2424 = vmatprep.mubr.bf16.mxu1 %v1813_v51  ;;  %v1822_v13 = vshll.u32 %v5400_v1, 16  ;;  %v4225_v4 = vld [vmem:[#allocation10 + $0x218] ss:$12 sps:$4 sm:$0xff]   ;;  %vm1719_vm6 = vcmp.eq.s32.totalorder %v1718_v50, 1  ;;  %v1884_v50 = vrot.slane %v5379_v27, 1 }
 0x2dd   : > { %v1689_v42 = vadd.f32 %v5343_v11, %v1670_v54  ;;  %v1671_v6 = vmul.f32 %v5341_v5, %v1652_v63  ;;  %2592 = vmatprep.mubr.bf16.mxu0 %v1813_v51  ;;  %v1432_v7 = vpop.f32.mrb[24].mxu0  ;;  %2425 = vmatmul.mubr.bf16.gmra.mrb[52].mxu1 %v5384_v29  ;;  %v1817_v12 = vshll.u32 %v5405_v55, 16  ;;  %v1743_v15 = vshrl.u32 %v1708_v62, 16 }
 0x2de   : > { %2593 = vmatmul.mubr.bf16.gmra.mrb[40].mxu0 %v5384_v29  ;;  %v1433_v9 = vpop.f32.mrb[25].mxu0  ;;  %2474 = vmatpush1.bf16.msra.mxu1 %v4204_v0  ;;  %v1746_v23 = vshll.u32 %v1708_v62, 16  ;;  %v1815_v61 = vshrl.u32 %v5405_v55, 16  ;;  %v1824_v35 = vrot.slane %v1822_v13, 1 }
 0x2df   : > { %v1690_v16 = vadd.f32 %v5343_v11, %v1671_v6  ;;  %v1641_v17 = vadd.f32 %v1433_v9, %v1422_v49  ;;  %v1435_v18 = vpop.f32.mrb[26].mxu0  ;;  %3724 = vmatpush3.bf16.msra.mxu0 %v4215_v46  ;;  %v1819_v25 = vrot.slane %v1817_v12, 1  ;;  %2475 = vmatprep.subr.bf16.mxu1 %v4210_v2  ;;  %v1745_v28 = vrot.slane %v1743_v15, 7  ;;  %v4224_v46 = vld [vmem:[#allocation10 + $0x200] ss:$12 sps:$4 sm:$0xff]  }
 0x2e0   : > { %v1436_v24 = vpop.f32.mrb[27].mxu0  ;;  %3725 = vmatprep.subr.bf16.mxu0 %v4216_v3  ;;  %v1701_v48 = vmax.f32 %v1689_v42, 0.0  ;;  %v4221_v9 = vld [vmem:[#allocation10 + $0x210] ss:$12 sps:$4 sm:$0xff]  }
 0x2e1   : > { %v1702_v30 = vmax.f32 %v1690_v16, 0.0  ;;  %v1653_v33 = vadd.f32 %v1641_v17, %v5332_v10  ;;  %v1642_v34 = vadd.f32 %v1436_v24, %v1426_v38  ;;  %v1820_v49 = vor.u32 %v1819_v25, %v1815_v61  ;;  %v4229_v15 = vld [vmem:[#allocation10 + $0x230] ss:$12 sps:$4 sm:$0xff]   ;;  %v4226_v24 = vld [vmem:[#allocation10 + $0x228] ss:$12 sps:$4 sm:$0xff]  }
 0x2e2   : > { %v1748_v36 = vor.u32 %v1746_v23, %v1745_v28  ;;  %2476 = vmatpush1.bf16.msra.mxu1 %v4208_v14  ;;  %v5425_v19 = vsel %vm5353_vm5, %v1745_v28, 0  ;;  %v4228_v14 = vld [vmem:[#allocation10 + $0x22c] ss:$12 sps:$4 sm:$0xff]  }
 0x2e3   : > { %v1709_v41 = vpack.c.bf16 %v1702_v30, %v1701_v48  ;;  %v1672_v39 = vmul.f32 %v5341_v5, %v1653_v33  ;;  %v1654_v40 = vadd.f32 %v1642_v34, %v5336_v56  ;;  %3726 = vmatpush3.bf16.msra.mxu0 %v4216_v3  ;;  %v1825_v10 = vsel %vm617_vm0, %v1820_v49, %v1824_v35  ;;  %v4230_v30 = vld [vmem:[#allocation14] sm:$0xff]  }
 0x2e4   : > { %v5430_v38 = vsel %vm5353_vm5, 0, %v1748_v36  ;;  %2477 = vmatprep.subr.bf16.mxu1 %v4214_v20  ;;  %3727 = vmatprep.subr.bf16.mxu0 %v4220_v21  ;;  %v1834_v58 = vshll.u32 %v5425_v19, 16  ;;  %v1890_v27 = vrot.slane %v5425_v19, 1  ;;  %v4234_v19 = vld [vmem:[#allocation14 + $0x20] sm:$0xff]  }
 0x2e5   : > { %v1691_v56 = vadd.f32 %v5343_v11, %v1672_v39  ;;  %v1673_v31 = vmul.f32 %v5341_v5, %v1654_v40  ;;  %2434 = vmatprep.mubr.bf16.mxu1 %v1825_v10  ;;  %2598 = vmatprep.mubr.bf16.mxu0 %v1825_v10  ;;  %v1440_v43 = vpop.f32.mrb[32].mxu0  ;;  %v1829_v57 = vshll.u32 %v5430_v38, 16  ;;  %v1750_v52 = vshrl.u32 %v1709_v41, 16  ;;  %v4223_v5 = vld [vmem:[#allocation10 + $0x214] ss:$12 sps:$4 sm:$0xff]  }
 0x2e6   : > { %2435 = vmatmul.mubr.bf16.gmra.mrb[56].mxu1 %v5405_v55  ;;  %2599 = vmatmul.mubr.bf16.gmra.mrb[44].mxu0 %v5405_v55  ;;  %v1441_v53 = vpop.f32.mrb[33].mxu0  ;;  %v1753_v32 = vshll.u32 %v1709_v41, 16  ;;  %v1827_v62 = vshrl.u32 %v5430_v38, 16  ;;  %v1836_v42 = vrot.slane %v1834_v58, 1  ;;  %v1886_v43 = vrot.slane %v5405_v55, 1 }
 0x2e7   : > { %v1692_v22 = vadd.f32 %v5343_v11, %v1673_v31  ;;  %2478 = vmatpush1.bf16.msra.mxu1 %v4212_v44  ;;  %3728 = vmatpush3.bf16.msra.mxu0 %v4220_v21  ;;  %v1442_v60 = vpop.f32.mrb[34].mxu0  ;;  %v1831_v54 = vrot.slane %v1829_v57, 1  ;;  %v1752_v63 = vrot.slane %v1750_v52, 7  ;;  %v1703_v51 = vmax.f32 %v1691_v56, 0.0  ;;  %v4231_v57 = vld [vmem:[#allocation14 + $0x8] sm:$0xff]   ;;  %v4232_v52 = vld [vmem:[#allocation14 + $0x10] sm:$0xff]  }
 0x2e8   : > { %2479 = vmatprep.subr.bf16.mxu1 %v4219_v45  ;;  %3729 = vmatprep.subr.bf16.mxu0 %v4224_v46  ;;  %v1443_v0 = vpop.f32.mrb[35].mxu0  ;;  %v1880_v45 = vrot.slane %v5366_v59, 1  ;;  %v1883_v31 = vrot.slane %v5384_v29, 1  ;;  %v1887_v59 = vrot.slane %v5400_v1, 1  ;;  %v1889_v29 = vrot.slane %v5430_v38, 1 }
 0x2e9   : > { %v1704_v2 = vmax.f32 %v1692_v22, 0.0  ;;  %v1832_v3 = vor.u32 %v1831_v54, %v1827_v62  ;;  %v1755_v6 = vor.u32 %v1753_v32, %v1752_v63  ;;  %v5443_v11 = vsel %vm5353_vm5, %v1752_v63, 0  ;;  %v4238_v32 = vld [vmem:[%s5143_s0 + $0x18] sm:$0xf]  ;;  %v4239_v63 = vld [vmem:[%s5143_s0 + $0x1c] sm:$0xf] }
 0x2ea   : > { %v1846_v18 = vshll.u32 %v5443_v11, 16  ;;  %v1882_v56 = vsel %vm722_vm1, %v1880_v45, %v1881_v37  ;;  %v1885_v58 = vsel %vm722_vm1, %v1883_v31, %v1884_v50  ;;  %v1888_v26 = vsel %vm722_vm1, %v1886_v43, %v1887_v59  ;;  %v4246_v59 = vld [vmem:[%s5143_s0 + $0x3c] sm:$0xf] }
 0x2eb   : > { %v1710_v7 = vpack.c.bf16 %v1704_v2, %v1703_v51  ;;  %2480 = vmatpush1.bf16.msra.mxu1 %v4217_v8  ;;  %3730 = vmatpush3.bf16.msra.mxu0 %v4224_v46  ;;  %v1837_v12 = vsel %vm617_vm0, %v1832_v3, %v1836_v42  ;;  %v5448_v13 = vsel %vm5353_vm5, 0, %v1755_v6  ;;  %v1893_v1 = vrot.slane %v5443_v11, 1  ;;  %v4233_v8 = vld [vmem:[#allocation14 + $0x18] sm:$0xff]   ;;  %v4236_v2 = vld [vmem:[#allocation14 + $0x30] sm:$0xff]  }
 0x2ec   : > { %2481 = vmatprep.subr.bf16.mxu1 %v4223_v5  ;;  %3731 = vmatprep.subr.bf16.mxu0 %v4225_v4  ;;  %v1841_v17 = vshll.u32 %v5448_v13, 16  ;;  %v1839_v21 = vshrl.u32 %v5448_v13, 16  ;;  %v1848_v48 = vrot.slane %v1846_v18, 1  ;;  %v1892_v55 = vrot.slane %v5448_v13, 1  ;;  %v4242_v18 = vld [vmem:[%s5143_s0 + $0x20] sm:$0x1] }
 0x2ed   : > { %v1720_v16 = vsel %vm1719_vm6, %v1710_v7, 0  ;;  %2444 = vmatprep.mubr.bf16.mxu1 %v1837_v12  ;;  %2606 = vmatprep.mubr.bf16.mxu0 %v1837_v12  ;;  %v1891_v53 = vsel %vm722_vm1, %v1889_v29, %v1890_v27  ;;  %v2758_v62 = vshrl.u32 %v4238_v32, 16  ;;  %v2761_v54 = vshll.u32 %v4238_v32, 16  ;;  %v4237_v7 = vld [vmem:[#allocation14 + $0x38] sm:$0xff]  }
 0x2ee   : > { %2445 = vmatmul.mubr.bf16.gmra.mrb[60].mxu1 %v5430_v38  ;;  %2607 = vmatmul.mubr.bf16.gmra.mrb[48].mxu0 %v5430_v38  ;;  %v1757_v20 = vshrl.u32 %v1720_v16, 16  ;;  %v1843_v23 = vrot.slane %v1841_v17, 1  ;;  %v1760_v61 = vshll.u32 %v1720_v16, 16  ;;  %v5483_v22 = vsel %vm722_vm1, %v1892_v55, %v1893_v1  ;;  %v4248_v1 = vld [vmem:[%s5143_s0 + $0x38] sm:$0x1] }
 0x2ef   : > { %2482 = vmatpush1.bf16.msra.mxu1 %v4221_v9  ;;  %3732 = vmatpush3.bf16.msra.mxu0 %v4225_v4  ;;  %v4235_v4 = vld [vmem:[#allocation14 + $0x28] sm:$0xff]   ;;  %v2767_v0 = vshll.u32 %v4239_v63, 16  ;;  %v2771_v51 = vshrl.u32 %v4239_v63, 16  ;;  %v2760_v3 = vrot.slane %v2758_v62, 4  ;;  %v2763_v42 = vrot.slane %v2761_v54, 5 }
 0x2f0   : > { %v1759_v25 = vrot.slane %v1757_v20, 7  ;;  %2483 = vmatprep.subr.bf16.mxu1 %v4228_v14  ;;  %3733 = vmatprep.subr.bf16.mxu0 %v4229_v15  ;;  %v1844_v28 = vor.u32 %v1843_v23, %v1839_v21  ;;  %v4240_v9 = vld [vmem:[%s5143_s0 + $0x24] sm:$0xf]  ;;  %v4241_v14 = vld [vmem:[%s5143_s0 + $0x28] sm:$0xf]  ;;  %v2777_v20 = vshll.u32 %v4242_v18, 16 }
 0x2f1   : > { %v2769_v6 = vrot.slane %v2767_v0, 5  ;;  %v2773_v11 = vrot.slane %v2771_v51, 4  ;;  %v2782_v12 = vshrl.u32 %v4240_v9, 16  ;;  %v2764_v16 = vor.u32 %v2763_v42, %v2760_v3  ;;  %v4243_v23 = vld [vmem:[%s5143_s0 + $0x30] sm:$0xf] }
 0x2f2   : > { %v1762_v33 = vor.u32 %v1760_v61, %v1759_v25  ;;  %v5457_v34 = vsel %vm5353_vm5, %v1759_v25, 0  ;;  %v1849_v49 = vsel %vm617_vm0, %v1844_v28, %v1848_v48  ;;  %v2795_v21 = vshrl.u32 %v4241_v14, 16  ;;  %v4244_v25 = vld [vmem:[%s5143_s0 + $0x34] sm:$0xf]  ;;  %v4249_v42 = vld [vmem:[%s5143_s0 + $0x44] sm:$0x1] }
 0x2f3   : > { %2484 = vmatpush1.bf16.msra.mxu1 %v4226_v24  ;;  %3734 = vmatpush3.bf16.msra.mxu0 %v4229_v15  ;;  %v1858_v41 = vshll.u32 %v5457_v34, 16  ;;  %v1896_v5 = vrot.slane %v5457_v34, 1  ;;  %v2791_v15 = vshll.u32 %v4241_v14, 16  ;;  %v2774_v17 = vor.u32 %v2773_v11, %v2769_v6 }
 0x2f4   : > { %2454 = vmatprep.mubr.bf16.mxu1 %v1849_v49  ;;  %2614 = vmatprep.mubr.bf16.mxu0 %v1849_v49  ;;  %v1783_v35 = vsel %vm5353_vm5, 0, %v1762_v33  ;;  %v2806_v24 = vshrl.u32 %v4243_v23, 16  ;;  %v2809_v61 = vshll.u32 %v4243_v23, 16  ;;  %v2815_v28 = vshll.u32 %v4244_v25, 16 }
 0x2f5   : > { %v1853_v36 = vshll.u32 %v1783_v35, 16  ;;  %3747 = vmatprep.subr.bf16.mxu1 %v4230_v30  ;;  %v1851_v39 = vshrl.u32 %v1783_v35, 16  ;;  %v1860_v10 = vrot.slane %v1858_v41, 1  ;;  %v1895_v38 = vrot.slane %v1783_v35, 1 }
 0x2f6   : > { %2455 = vmatmul.mubr.bf16.gmra.mrb[64].mxu1 %v5448_v13  ;;  %2615 = vmatmul.mubr.bf16.gmra.mrb[52].mxu0 %v5448_v13  ;;  %v2785_v13 = vshll.u32 %v4240_v9, 16  ;;  %v2819_v48 = vshrl.u32 %v4244_v25, 16  ;;  %v2793_v34 = vrot.slane %v2791_v15, 5  ;;  %v2765_v49 = vrot.slane %v2764_v16, 4 }
 0x2f7   : > { %v1855_v40 = vrot.slane %v1853_v36, 1  ;;  %v5489_v60 = vsel %vm722_vm1, %v1895_v38, %v1896_v5  ;;  %v2779_v36 = vrot.slane %v2777_v20, 5  ;;  %v2797_v41 = vrot.slane %v2795_v21, 4 }
 0x2f8   : > { %v2787_v33 = vrot.slane %v2785_v13, 5  ;;  %v2821_v45 = vrot.slane %v2819_v48, 4 }
 0x2f9   : > { %v1856_v44 = vor.u32 %v1855_v40, %v1851_v39  ;;  %v2808_v40 = vrot.slane %v2806_v24, 4  ;;  %v2798_v50 = vor.u32 %v2797_v41, %v2793_v34 }
 0x2fb   : > { %v1861_v46 = vsel %vm617_vm0, %v1856_v44, %v1860_v10  ;;  %v2811_v44 = vrot.slane %v2809_v61, 5  ;;  %v2817_v10 = vrot.slane %v2815_v28, 5  ;;  %v2799_v38 = vrot.slane %v2798_v50, 4 }
 0x2fc   : > { %2462 = vmatprep.mubr.bf16.mxu1 %v1861_v46  ;;  %2622 = vmatprep.mubr.bf16.mxu0 %v1861_v46  ;;  %v4245_v46 = vld [vmem:[%s5143_s0 + $0x2c] sm:$0x1] }
 0x2fd   : > { %v2801_v37 = vshll.u32 %v4245_v46, 16  ;;  %v2812_v55 = vor.u32 %v2811_v44, %v2808_v40  ;;  %v2822_v27 = vor.u32 %v2821_v45, %v2817_v10 }
 0x2fe   : > { %2463 = vmatmul.mubr.bf16.gmra.mrb[68].mxu1 %v1783_v35  ;;  %2623 = vmatmul.mubr.bf16.gmra.mrb[56].mxu0 %v1783_v35  ;;  %v2775_v35 = vrot.slane %v2774_v17, 4 }
 0x2ff   : > { %3735 = vmatprep.mubr.bf16.mxu0 %v1882_v56  ;;  %2501 = vmatprep.mubr.bf16.mxu1 %v4690_v47  ;;  %v2823_v54 = vrot.slane %v2822_v27, 4 }
 0x300   : > { %v2780_v31 = vsel %vm5503_vm9, %v2775_v35, %v2779_v36 }
 0x306   : > { %2502 = vmatmul.mubr.bf16.vlgmr.msra.gmra.mrb[48].mxu1 %v1882_v56  ;;  %3736 = vmatmul.mubr.bf16.vlgmr.msra.gmra.mrb[60].mxu0 %v1885_v58  ;;  %v2770_v56 = vsel %vm5503_vm9, %v2765_v49, %v2769_v6  ;;  %v2849_v6 = vshll.u32 %v4249_v42, 16 }
 0x307   : > { %3739 = vmatprep.mubr.bf16.mxu0 %v1888_v26  ;;  %3748 = vmatpush3.bf16.msra.mxu1 %v4230_v30  ;;  %v2784_v30 = vrot.slane %v2782_v12, 4 }
 0x308   : > { %3749 = vmatprep.subr.bf16.mxu1 %v4231_v57  ;;  %2509 = vmatprep.mubr.bf16.mxu1 %v4690_v47  ;;  %v2851_v14 = vrot.slane %v2849_v6, 5 }
 0x309   : > { %v2788_v43 = vor.u32 %v2787_v33, %v2784_v30 }
 0x30b   : > { %3750 = vmatpush3.bf16.msra.mxu1 %v4231_v57  ;;  %v2830_v57 = vshrl.u32 %v4246_v59, 16 }
 0x30c   : > { %3751 = vmatprep.subr.bf16.mxu1 %v4232_v52 }
 0x30d   : > { %v2832_v5 = vrot.slane %v2830_v57, 4 }
 0x30e   : > { %2510 = vmatmul.mubr.bf16.gmra.mrb[52].mxu1 %v1885_v58  ;;  %3740 = vmatmul.mubr.bf16.gmra.mrb[64].mxu0 %v1891_v53  ;;  %v2833_v58 = vshll.u32 %v4246_v59, 16 }
 0x30f   : > { %3743 = vmatprep.mubr.bf16.mxu0 %v5483_v22  ;;  %3752 = vmatpush3.bf16.msra.mxu1 %v4232_v52 }
 0x310   : > { %2519 = vmatprep.mubr.bf16.mxu1 %v4690_v47  ;;  %3753 = vmatprep.subr.bf16.mxu1 %v4233_v8 }
 0x313   : > { %3754 = vmatpush3.bf16.msra.mxu1 %v4233_v8  ;;  %v2825_v8 = vshll.u32 %v4248_v1, 16 }
 0x314   : > { %3755 = vmatprep.subr.bf16.mxu1 %v4234_v19 }
 0x315   : > { %v2827_v63 = vrot.slane %v2825_v8, 5 }
 0x316   : > { %2520 = vmatmul.mubr.bf16.gmra.mrb[56].mxu1 %v1888_v26  ;;  %3744 = vmatmul.mubr.bf16.gmra.mrb[68].mxu0 %v5489_v60  ;;  %v4247_v26 = vld [vmem:[%s5143_s0 + $0x40] sm:$0xf]  ;;  %s3494_s0 = sshll.u32 %s3098_s27, 6  ;;  %s4536_s27 = sshll.u32 %s4691_s1, 4  ;;  %s4537_s27 = int_to_ptr.vmem [resolvable:$false] %s4536_s27 }
 0x317   : > { %2529 = vmatprep.mubr.bf16.mxu1 %v4690_v47  ;;  %3756 = vmatpush3.bf16.msra.mxu1 %v4234_v19  ;;  %v2839_v52 = vshll.u32 %v4247_v26, 16  ;;  %v2843_v29 = vshrl.u32 %v4247_v26, 16  ;;  %v2789_v19 = vrot.slane %v2788_v43, 4  ;;  %s5541_s4 = scalar_lea.hbm %s5686_s16, %s3494_s0  ;;  %s4538_s5 = scalar_lea.vmem %s4537_s27, 1024 }
 0x318   : > { %3757 = vmatprep.subr.bf16.mxu1 %v4235_v4  ;;  %p4539_p7 = scmp.lt.s32.totalorder %s5536_s20, %s4537_s27  ;;  %p4540_p3 = scmp.lt.s32.totalorder %s4538_s5, %s4532_s24 }
 0x319   : > { %v2841_v32 = vrot.slane %v2839_v52, 5  ;;  %v2845_v62 = vrot.slane %v2843_v29, 4  ;;  %v2794_v0 = vsel %vm5503_vm9, %v2789_v19, %v2793_v34 }
 0x31a   : > { %p4541_p13 = por %p4540_p3, %p4539_p7 }
 0x31b   : > { %3758 = vmatpush3.bf16.msra.mxu1 %v4235_v4  ;;  %v2835_v4 = vrot.slane %v2833_v58, 5  ;;  %v2846_v3 = vor.u32 %v2845_v62, %v2841_v32 }
 0x31c   : > { %3759 = vmatprep.subr.bf16.mxu1 %v4236_v2  ;;  %p4542_p4 = pnand %p4541_p13, %p4535_p10 }
 0x31d   : > { %v2847_v13 = vrot.slane %v2846_v3, 4 }
 0x31e   : > { %2530 = vmatmul.mubr.bf16.gmra.mrb[60].mxu1 %v1891_v53  ;;  %v2803_v53 = vrot.slane %v2801_v37, 5 }
 0x31f   : > { %2539 = vmatprep.mubr.bf16.mxu1 %v4690_v47  ;;  %3760 = vmatpush3.bf16.msra.mxu1 %v4236_v2  ;;  %v2836_v2 = vor.u32 %v2835_v4, %v2832_v5  ;;  %v2852_v16 = vsel %vm5503_vm9, %v2847_v13, %v2851_v14 }
 0x320   : > { %3761 = vmatprep.subr.bf16.mxu1 %v4237_v7  ;;  %v2804_v51 = vsel %vm5503_vm9, %v2799_v38, %v2803_v53 }
 0x321   : > { %v3469_v9 = vcombine.low %v2794_v0, %v2804_v51 }
 0x323   : > { %3762 = vmatpush3.bf16.msra.mxu1 %v4237_v7  ;;  %v2828_v7 = vsel %vm5503_vm9, %v2823_v54, %v2827_v63 }
 0x326   : > { %2540 = vmatmul.mubr.bf16.gmra.mrb[64].mxu1 %v5483_v22  ;;  %v3468_v22 = vcombine.low %v2770_v56, %v2780_v31 }
 0x327   : > { %2547 = vmatprep.mubr.bf16.mxu1 %v4690_v47  ;;  %v2813_v47 = vrot.slane %v2812_v55, 4 }
 0x329   : > { %v2818_v11 = vsel %vm5503_vm9, %v2813_v47, %v2817_v10 }
 0x32a   : > { %v3470_v12 = vcombine.low %v2818_v11, %v2828_v7 }
 0x32e   : > { %2548 = vmatmul.mubr.bf16.gmra.mrb[72].mxu1 %v5489_v60  ;;  %v2837_v60 = vrot.slane %v2836_v2, 4 }
 0x32f   : > { %3763 = vmatprep.mubr.bf16.mxu1 %v3468_v22 }
 0x330   : > { %v2842_v15 = vsel %vm5503_vm9, %v2837_v60, %v2841_v32 }
 0x331   : > { %v3471_v17 = vcombine.low %v2842_v15, %v2852_v16 }
 0x336   : > { %3764 = vmatmul.mubr.bf16.vlgmr.msra.gmra.mrb[76].mxu1 %v3469_v9 }
 0x337   : > { %3767 = vmatprep.mubr.bf16.mxu1 %v3470_v12 }
 0x33e   : > { %3768 = vmatmul.mubr.bf16.gmra.mrb[80].mxu1 %v3471_v17 }
 0x3a8   : > { %v3625_v18 = vpop.f32.mrb[36].mxu0 }
 0x3a9   : > { %v3626_v20 = vpop.f32.mrb[37].mxu0 }
 0x3aa   : > { %v3628_v21 = vpop.f32.mrb[38].mxu0 }
 0x3ab   : > { %v3629_v23 = vpop.f32.mrb[39].mxu0 }
 0x3b1   : > { %v3631_v24 = vpop.f32.mrb[40].mxu0 }
 0x3b2   : > { %v3632_v61 = vpop.f32.mrb[41].mxu0 }
 0x3b3   : > { %v3634_v25 = vpop.f32.mrb[42].mxu0 }
 0x3b4   : > { %v3635_v28 = vpop.f32.mrb[43].mxu0 }
 0x3b9   : > { %v3637_v48 = vpop.f32.mrb[44].mxu0 }
 0x3ba   : > { %v3638_v30 = vpop.f32.mrb[45].mxu0 }
 0x3bb   : > { %v3639_v33 = vadd.f32 %v3638_v30, %v3637_v48  ;;  %v3640_v34 = vpop.f32.mrb[46].mxu0 }
 0x3bc   : > { %v3641_v49 = vpop.f32.mrb[47].mxu0 }
 0x3bd   : > { %v3642_v35 = vadd.f32 %v3641_v49, %v3640_v34 }
 0x3c1   : > { %v3643_v36 = vpop.f32.mrb[48].mxu0 }
 0x3c2   : > { %v3644_v41 = vpop.f32.mrb[49].mxu0 }
 0x3c3   : > { %v3645_v39 = vadd.f32 %v3644_v41, %v3643_v36  ;;  %v3646_v40 = vpop.f32.mrb[50].mxu0 }
 0x3c4   : > { %v3647_v44 = vpop.f32.mrb[51].mxu0 }
 0x3c5   : > { %v3648_v10 = vadd.f32 %v3647_v44, %v3646_v40 }
 0x3c9   : > { %v3649_v45 = vpop.f32.mrb[52].mxu0 }
 0x3ca   : > { %v3650_v46 = vpop.f32.mrb[53].mxu0 }
 0x3cb   : > { %v3651_v37 = vadd.f32 %v3650_v46, %v3649_v45  ;;  %v3652_v56 = vpop.f32.mrb[54].mxu0 }
 0x3cc   : > { %v3653_v31 = vpop.f32.mrb[55].mxu0 }
 0x3cd   : > { %v3654_v43 = vadd.f32 %v3653_v31, %v3652_v56 }
 0x3d1   : > { %v2464_v50 = vpop.f32.mrb[68].mxu1  ;;  %v3655_v59 = vpop.f32.mrb[56].mxu0 }
 0x3d2   : > { %v2465_v57 = vpop.f32.mrb[69].mxu1  ;;  %v3656_v58 = vpop.f32.mrb[57].mxu0 }
 0x3d3   : > { %v3657_v26 = vadd.f32 %v3656_v58, %v3655_v59  ;;  %v2466_v52 = vpop.f32.mrb[70].mxu1  ;;  %v3658_v29 = vpop.f32.mrb[58].mxu0 }
 0x3d4   : > { %v2467_v55 = vpop.f32.mrb[71].mxu1  ;;  %v3659_v27 = vpop.f32.mrb[59].mxu0 }
 0x3d5   : > { %v3660_v1 = vadd.f32 %v3659_v27, %v3658_v29  ;;  %v3466_v29 = vld [vmem:[#allocation11] ss:$0 sm:$0xff]  ;;  %v3480_v55 = vld [vmem:[#allocation16] ss:$0 sm:$0xff] }
 0x3d9   : > { %v2503_v8 = vpop.f32.mrb[48].mxu1  ;;  %v3737_v53 = vpop.f32.mrb[60].mxu0 }
 0x3da   : > { %v2505_v22 = vpop.f32.mrb[49].mxu1  ;;  %v2665_v19 = vpop.f32.mrb[61].mxu0  ;;  %v3481_v53 = vld [vmem:[#allocation17] ss:$0 sm:$0xff] }
 0x3db   : > { %v2506_v38 = vpop.f32.mrb[50].mxu1  ;;  %v3738_v5 = vpop.f32.mrb[62].mxu0  ;;  %v3467_v19 = vld [vmem:[#allocation13] ss:$0 sm:$0xff] }
 0x3dc   : > { %v2508_v4 = vpop.f32.mrb[51].mxu1  ;;  %v2667_v32 = vpop.f32.mrb[63].mxu0 }
 0x3e1   : > { %v2511_v62 = vpop.f32.mrb[52].mxu1  ;;  %v3741_v47 = vpop.f32.mrb[64].mxu0 }
 0x3e2   : > { %v2686_v54 = vadd.f32 %v3741_v47, %v3645_v39  ;;  %v2513_v63 = vpop.f32.mrb[53].mxu1  ;;  %v2677_v0 = vpop.f32.mrb[65].mxu0 }
 0x3e3   : > { %v2708_v51 = vadd.f32 %v2513_v63, %v2503_v8  ;;  %v2678_v2 = vadd.f32 %v3639_v33, %v2677_v0  ;;  %v2515_v3 = vpop.f32.mrb[54].mxu1  ;;  %v3742_v42 = vpop.f32.mrb[66].mxu0 }
 0x3e4   : > { %v2689_v6 = vadd.f32 %v3742_v42, %v3648_v10  ;;  %v2517_v11 = vpop.f32.mrb[55].mxu1  ;;  %v2680_v7 = vpop.f32.mrb[67].mxu0 }
 0x3e5   : > { %v2716_v9 = vadd.f32 %v2708_v51, %v2678_v2  ;;  %v2709_v12 = vadd.f32 %v2517_v11, %v2506_v38  ;;  %v2681_v60 = vadd.f32 %v3642_v35, %v2680_v7 }
 0x3e7   : > { %v2717_v13 = vadd.f32 %v2709_v12, %v2681_v60 }
 0x3e9   : > { %v2521_v14 = vpop.f32.mrb[56].mxu1  ;;  %v3745_v15 = vpop.f32.mrb[68].mxu0  ;;  %v2732_v4 = vmul.f32 %v3466_v29, %v2717_v13 }
 0x3ea   : > { %v2702_v16 = vadd.f32 %v3745_v15, %v3657_v26  ;;  %v2523_v17 = vpop.f32.mrb[57].mxu1  ;;  %v2693_v18 = vpop.f32.mrb[69].mxu0 }
 0x3eb   : > { %v2710_v20 = vadd.f32 %v2523_v17, %v2511_v62  ;;  %v2694_v21 = vadd.f32 %v3651_v37, %v2693_v18  ;;  %v2525_v23 = vpop.f32.mrb[58].mxu1  ;;  %v3746_v24 = vpop.f32.mrb[70].mxu0 }
 0x3ec   : > { %v2705_v61 = vadd.f32 %v3746_v24, %v3660_v1  ;;  %v2527_v25 = vpop.f32.mrb[59].mxu1  ;;  %v2696_v28 = vpop.f32.mrb[71].mxu0  ;;  %v2731_v1 = vmul.f32 %v3466_v29, %v2716_v9  ;;  %v2747_v9 = vadd.f32 %v3467_v19, %v2732_v4 }
 0x3ed   : > { %v2718_v48 = vadd.f32 %v2710_v20, %v2686_v54  ;;  %v2711_v30 = vadd.f32 %v2527_v25, %v2515_v3  ;;  %v2697_v33 = vadd.f32 %v3654_v43, %v2696_v28 }
 0x3ee   : > { %v2746_v51 = vadd.f32 %v3467_v19, %v2731_v1 }
 0x3ef   : > { %v2719_v34 = vadd.f32 %v2711_v30, %v2689_v6  ;;  %v2733_v27 = vmul.f32 %v3466_v29, %v2718_v48 }
 0x3f1   : > { %v2531_v49 = vpop.f32.mrb[60].mxu1  ;;  %v2734_v22 = vmul.f32 %v3466_v29, %v2719_v34  ;;  %v2748_v47 = vadd.f32 %v3467_v19, %v2733_v27 }
 0x3f2   : > { %v2533_v36 = vpop.f32.mrb[61].mxu1 }
 0x3f3   : > { %v2712_v35 = vadd.f32 %v2533_v36, %v2521_v14  ;;  %v2535_v41 = vpop.f32.mrb[62].mxu1  ;;  %v2749_v6 = vadd.f32 %v3467_v19, %v2734_v22 }
 0x3f4   : > { %v2537_v39 = vpop.f32.mrb[63].mxu1 }
 0x3f5   : > { %v2720_v40 = vadd.f32 %v2712_v35, %v2694_v21  ;;  %v2713_v44 = vadd.f32 %v2537_v39, %v2525_v23 }
 0x3f7   : > { %v2721_v10 = vadd.f32 %v2713_v44, %v2697_v33  ;;  %v2735_v14 = vmul.f32 %v3466_v29, %v2720_v40 }
 0x3f9   : > { %v2541_v45 = vpop.f32.mrb[64].mxu1  ;;  %v2736_v24 = vmul.f32 %v3466_v29, %v2721_v10 }
 0x3fa   : > { %v2542_v46 = vpop.f32.mrb[65].mxu1 }
 0x3fb   : > { %v2714_v37 = vadd.f32 %v2542_v46, %v2531_v49  ;;  %v2544_v56 = vpop.f32.mrb[66].mxu1 }
 0x3fc   : > { %v2545_v31 = vpop.f32.mrb[67].mxu1 }
 0x3fd   : > { %v2722_v50 = vadd.f32 %v2714_v37, %v2702_v16  ;;  %v2715_v59 = vadd.f32 %v2545_v31, %v2535_v41  ;;  %v2750_v41 = vadd.f32 %v3467_v19, %v2735_v14  ;;  %v2751_v37 = vadd.f32 %v3467_v19, %v2736_v24 }
 0x3ff   : > { %v2723_v57 = vadd.f32 %v2715_v59, %v2705_v61  ;;  %v2737_v60 = vmul.f32 %v3466_v29, %v2722_v50 }
 0x401   : > { %v2549_v58 = vpop.f32.mrb[72].mxu1  ;;  %v2738_v17 = vmul.f32 %v3466_v29, %v2723_v57  ;;  %v2752_v33 = vadd.f32 %v3467_v19, %v2737_v60 }
 0x402   : > { %v2550_v26 = vpop.f32.mrb[73].mxu1 }
 0x403   : > { %v2551_v43 = vpop.f32.mrb[74].mxu1  ;;  %v2753_v45 = vadd.f32 %v3467_v19, %v2738_v17 }
 0x404   : > { %v2552_v52 = vpop.f32.mrb[75].mxu1 }
 0x409   : > { %v3765_v8 = vpop.f32.mrb[76].mxu1 }
 0x40a   : > { %v3007_v38 = vmul.f32 %v3765_v8, %v3480_v55  ;;  %v2967_v5 = vpop.f32.mrb[77].mxu1 }
 0x40b   : > { %v3005_v32 = vmul.f32 %v3480_v55, %v2967_v5  ;;  %v3766_v62 = vpop.f32.mrb[78].mxu1 }
 0x40c   : > { %v3022_v54 = vadd.f32 %v3481_v53, %v3007_v38  ;;  %v3008_v63 = vmul.f32 %v3766_v62, %v3480_v55  ;;  %v2970_v0 = vpop.f32.mrb[79].mxu1 }
 0x40d   : > { %v3020_v2 = vadd.f32 %v3481_v53, %v3005_v32  ;;  %v3006_v3 = vmul.f32 %v3480_v55, %v2970_v0 }
 0x40e   : > { %v3030_v42 = vadd.f32 %v3022_v54, %v2748_v47  ;;  %v3023_v11 = vadd.f32 %v3481_v53, %v3008_v63 }
 0x40f   : > { %v3028_v7 = vadd.f32 %v3020_v2, %v2746_v51  ;;  %v3021_v12 = vadd.f32 %v3481_v53, %v3006_v3 }
 0x410   : > { %v3031_v13 = vadd.f32 %v3023_v11, %v2749_v6  ;;  %v3038_v18 = vmax.f32 %v3030_v42, 0.0 }
 0x411   : > { %v3029_v15 = vadd.f32 %v3021_v12, %v2747_v9  ;;  %v3769_v16 = vpop.f32.mrb[80].mxu1  ;;  %v3036_v61 = vmax.f32 %v3028_v7, 0.0 }
 0x412   : > { %v3039_v20 = vmax.f32 %v3031_v13, 0.0  ;;  %v3011_v21 = vmul.f32 %v3769_v16, %v3480_v55  ;;  %v2983_v23 = vpop.f32.mrb[81].mxu1 }
 0x413   : > { %v3037_v25 = vmax.f32 %v3029_v15, 0.0  ;;  %v3009_v28 = vmul.f32 %v3480_v55, %v2983_v23  ;;  %v3770_v48 = vpop.f32.mrb[82].mxu1 }
 0x414   : > { %v3514_v30 = vpack.c.bf16 %v3039_v20, %v3038_v18  ;;  %v3026_v34 = vadd.f32 %v3481_v53, %v3011_v21  ;;  %v3012_v49 = vmul.f32 %v3770_v48, %v3480_v55  ;;  %v2986_v36 = vpop.f32.mrb[83].mxu1 }
 0x415   : > { %v3509_v35 = vpack.c.bf16 %v3037_v25, %v3036_v61  ;;  %v3024_v39 = vadd.f32 %v3481_v53, %v3009_v28  ;;  %v3010_v40 = vmul.f32 %v3480_v55, %v2986_v36 }
 0x416   : > { %3526 = vst [vmem:[%s516_s2 + $0x8] sm:$0xff] %v3514_v30   ;;  %v3034_v44 = vadd.f32 %v3026_v34, %v2752_v33  ;;  %v3027_v10 = vadd.f32 %v3481_v53, %v3012_v49 }
 0x417   : > { %3510 = vst [vmem:[%s516_s2] sm:$0xff] %v3509_v35   ;;  %v3032_v46 = vadd.f32 %v3024_v39, %v2750_v41  ;;  %v3025_v56 = vadd.f32 %v3481_v53, %v3010_v40 }
 0x418   : > { %v3035_v31 = vadd.f32 %v3027_v10, %v2753_v45  ;;  %v3042_v59 = vmax.f32 %v3034_v44, 0.0 }
 0x419   : > { %v3033_v50 = vadd.f32 %v3025_v56, %v2751_v37  ;;  %v3040_v58 = vmax.f32 %v3032_v46, 0.0 }
 0x41a   : > { %v3043_v57 = vmax.f32 %v3035_v31, 0.0 }
 0x41b   : > { %v3041_v26 = vmax.f32 %v3033_v50, 0.0 }
 0x41c   : > { %v3524_v43 = vpack.c.bf16 %v3043_v57, %v3042_v59 }
 0x41d   : > { %v3519_v52 = vpack.c.bf16 %v3041_v26, %v3040_v58 }
 0x41e   : > { %3528 = vst [vmem:[%s516_s2 + $0x18] sm:$0xff] %v3524_v43  }
 0x41f   : > { %3527 = vst [vmem:[%s516_s2 + $0x10] sm:$0xff] %v3519_v52  }
 0x420   : > { %4545 = shalt.err (!%p4542_p4)
}
 0x421   : > { %s4546_s15 = scalar_lea.hbm %s5541_s4, 512  ;;  %s4550_s0 = scalar_lea.hbm %s5687_s30, 4096 }
 0x422   : > { %p4547_p6 = scmp.ne.s32.totalorder %s5541_s4, %s4546_s15  ;;  %p4551_p11 = scmp.lt.u32.totalorder %s5541_s4, %s5687_s30 }
 0x423   : > { %p4552_p0 = scmp.lt.u32.totalorder %s4550_s0, %s4546_s15  ;;  %p4554_p1 = scmp.lt.u32.totalorder %s4546_s15, %s5541_s4 }
 0x424   : > { %p4548_p8 = pnand %p4547_p6, %p5688_p2 }
 0x425   : > { %p4553_p5 = por %p4552_p0, %p4551_p11 }
 0x426   : > { %p4549_p12 = pneg %p4548_p8 }
 0x427   : > { %p4555_p9 = por %p4554_p1, %p4553_p5 }
 0x429   : > { %p4556_p10 = pnand %p4555_p9, %p4549_p12 }
 0x42b   : > { %4559 = shalt.err (!%p4556_p10)
}
 0x42c   : > { %s4692_s5 = smov 64   ;;  %s4693_s16 = smov 4  }
 0x42d   : > { %3860 = dma.vmem_to_hbm [thread:$0]  (%p5688_p2), %s5536_s20, 512, %s5541_s4, %s5545_s13, %s4692_s5, %s4692_s5, %s4693_s16  }
 0x42e PF: > { %s5689_s24 = sld [smem:[#allocation27_spill]]  ;;  %p3917_p7 = scmp.ge.s32.totalorder %s4674_s23, 2 }
 0x42f   : > { %p5690_p3 = scmp.ne.s32.totalorder %s5670_s11, 0 }
 0x431   : > { %p3895_p13 = pnand %p3917_p7, %p5690_p3 }
 0x434   : > { %s3116_s1 = sand.u32 1, %s5689_s24  }
 0x435   : > { %s3117_s27 = scalar_lea.sflag [#allocation4], %s3116_s1 }
 0x436   : > { %4629 = dma.done.wait (!%p3895_p13), %s3117_s27, 512  }
 0x437   : > { %4631 = vsyncadd (!%p3895_p13), %s3117_s27, 4294966784  ;;  %s31_s23 = sadd.s32 1, %s4674_s23   ;;  %s5691_s13 = sld [smem:[#allocation28_spill]] }
 0x438   : > { %p28_p4 = scmp.ge.s32.totalorder %s31_s23, 10   ;;  %s5692_s15 = sld [smem:[#allocation29_spill]] }
 0x439   : > { %s5693_s28 = smov %s5710_s14  ;;  %s5696_s16 = smov %s4650_s17 }
 0x43a   : > { %s5697_s17 = smov %s4654_s18  ;;  %s5698_s18 = smov %s5077_s19 }
 0x43b   : > { %s5699_s19 = smov %s4666_s21  ;;  %s5700_s20 = smov %s4670_s22 }
 0x43c   : > { %s5701_s21 = smov %s5704_s29  ;;  %s5702_s22 = smov %s5708_s10 }
 0x43d   :  { %30 = sbr.rel (!%p28_p4) target bundleno = 22 (0x16), region = 141 }
 0x43e   : > { %s5694_s14 = smov %s5692_s15  ;;  %s5695_s15 = smov %s5693_s28 }
 0x444   :  { %3122 = vsyncpa [#allocation3], 1 }
 0x445   :  { %3124 = vsyncpa [#allocation3 + $0x1], 1 }
 0x446   :  { %3125 = vsyncpa [#allocation6], 1 }
 0x447   :  { %3126 = vsyncpa [#allocation9], 1 }
 0x448   :  { %3127 = vsyncpa [#allocation12], 1 }
 0x449   :  { %3128 = vsyncpa [#allocation15], 1 }
 0x44a   :  { %3129 = vsyncpa [#allocation18], 1 }
 0x44b   :  { %3130 = vsyncpa [#allocation4], 1 }
 0x44c   :  { %3132 = vsyncpa [#allocation4 + $0x1], 1 }

</bundles_post_ra>
